<compile_context>
chip_gen: v7x
topology: tpu7x:2x2x1
jax: 0.10.0
libtpu: 0.0.40
codegen_flags: <defaults>
</compile_context>

<pallas_src>
import jax
import jax.numpy as jnp
from jax.experimental import pallas as pl
from jax.experimental.pallas import tpu as pltpu


def _m_kernel(x_ref, y_ref, z_ref, o_ref):
    # forward: 2*x + y + 2*z, strength-reduced to 2*(x + z) + y (pure VPU work).
    o_ref[...] = 2.0 * (x_ref[...] + z_ref[...]) + y_ref[...]


# --- tiling policy -----------------------------------------------------------------
_MIN_PALLAS_ELEMS = 64 * 1024   # below this, pallas_call launch/DMA overhead dominates
_MAX_COLS = 1024                # lane-dense slab width (multiple of 128)
_MAX_TM = 512                   # rows per block: 512 x 1024 f32 = 2 MiB/block max


def _min_sublanes(dtype):
    # dtype-packed minimum second-minor tile: f32 -> 8, bf16 -> 16, int8/fp8 -> 32
    return {4: 8, 2: 16, 1: 32}.get(jnp.dtype(dtype).itemsize, 8)


def _pick_cols(n, min_sub):
    """Widest lane-dense column count (multiple of 128) that tiles n with no padding."""
    for c in (_MAX_COLS, 512, 256, 128):
        if n % c == 0 and (n // c) % min_sub == 0:
            return c
    return None


def _pick_tm(rows, min_sub):
    """Largest multiple of min_sub dividing rows, capped so the grid has >= ~8 steps
    (DMA pipelining per v7x core) and blocks stay <= _MAX_TM rows."""
    target = max(min_sub, min(_MAX_TM, (rows // 8) // min_sub * min_sub))
    tm = min_sub
    for cand in range(min_sub, target + 1, min_sub):
        if rows % cand == 0:
            tm = cand
    return tm


def m_forward(x, y, z):
    """Elementwise 2*x + y + 2*z.

    Large, cleanly-tileable inputs go through a tiled Pallas TPU kernel; tiny or
    ragged inputs (including the module's (1, 2) tensors) use plain jnp, which XLA
    fuses into neighboring ops for free.
    """
    assert x.shape == y.shape == z.shape
    assert x.dtype == y.dtype == z.dtype
    orig_shape = x.shape
    n = x.size
    min_sub = _min_sublanes(x.dtype)

    cols = _pick_cols(n, min_sub) if n >= _MIN_PALLAS_ELEMS else None
    if cols is None:
        # Fast path: fixed pallas_call launch + per-step DMA overhead dwarfs two VPU
        # ops here, and padding/slicing copies would multiply HBM traffic.
        return 2 * x + y + 2 * z

    rows = n // cols
    tm = _pick_tm(rows, min_sub)

    # Contiguous reshapes only -> no pad, no copy, no output slice.
    xs = x.reshape(rows, cols)
    ys = y.reshape(rows, cols)
    zs = z.reshape(rows, cols)

    spec = pl.BlockSpec((tm, cols), lambda i: (i, 0))
    out = pl.pallas_call(
        _m_kernel,
        out_shape=jax.ShapeDtypeStruct((rows, cols), x.dtype),
        grid=(rows // tm,),
        in_specs=[spec, spec, spec],
        out_specs=spec,
        compiler_params=pltpu.CompilerParams(
            dimension_semantics=("parallel",),
            # 4 arrays x (<=2 MiB block) x 2 buffers <= 16 MiB of block buffers:
            # above v5e's 16 MiB default scoped limit (so raise it), comfortably
            # under v7x's 64 MiB physical VMEM.
            vmem_limit_bytes=48 * 1024 * 1024,
        ),
    )(xs, ys, zs)

    return out.reshape(orig_shape)


# TODO(synk): register_backward_hook(back_hook) only prints gradients during the
# backward pass; there is no forward-pass equivalent to translate, so it is omitted.

if __name__ == "__main__":
    # 1) The module's actual shapes: (1, 2) float32 (tiny -> fused jnp fast path,
    #    identical forward semantics).
    kx, ky, kz = jax.random.split(jax.random.PRNGKey(0), 3)
    x = jax.random.normal(kx, (1, 2), dtype=jnp.float32)
    y = jax.random.normal(ky, (1, 2), dtype=jnp.float32)
    z = jax.random.normal(kz, (1, 2), dtype=jnp.float32)

    out = jax.block_until_ready(m_forward(x, y, z))
    ref = 2 * x + y + 2 * z
    assert out.shape == (1, 2)
    assert jnp.allclose(out, ref, atol=1e-6), (out, ref)

    # 2) A larger shape to exercise the tiled Pallas path
    #    (cols=1024, tm=128 -> 8 grid steps, 512 KiB blocks, zero wrapper copies).
    kx2, ky2, kz2 = jax.random.split(jax.random.PRNGKey(1), 3)
    xb = jax.random.normal(kx2, (1024, 1024), dtype=jnp.float32)
    yb = jax.random.normal(ky2, (1024, 1024), dtype=jnp.float32)
    zb = jax.random.normal(kz2, (1024, 1024), dtype=jnp.float32)

    fwd = jax.jit(m_forward)
    outb = jax.block_until_ready(fwd(xb, yb, zb))
    refb = 2 * xb + yb + 2 * zb
    assert outb.shape == (1024, 1024)
    assert jnp.allclose(outb, refb, atol=1e-5), "large-shape mismatch"

    print("KERNEL_OK")
</pallas_src>

<mosaic_0001>
module attributes {stable_mosaic.version = 11 : i64} {
  func.func @_m_kernel(%arg0: i32, %arg1: memref<128x1024xf32, #tpu.memory_space<vmem>>, %arg2: memref<128x1024xf32, #tpu.memory_space<vmem>>, %arg3: memref<128x1024xf32, #tpu.memory_space<vmem>>, %arg4: memref<128x1024xf32, #tpu.memory_space<vmem>>) attributes {dimension_semantics = [#tpu.dimension_semantics<parallel>], iteration_bounds = array<i64: 8>, scalar_prefetch = 0 : i64, scratch_operands = 0 : i64, tpu.core_type = #tpu.core_type<tc>, window_params = [{transform_indices = @transform_0, window_bounds = array<i64: 128, 1024>}, {transform_indices = @transform_1, window_bounds = array<i64: 128, 1024>}, {transform_indices = @transform_2, window_bounds = array<i64: 128, 1024>}, {transform_indices = @transform_3, window_bounds = array<i64: 128, 1024>}]} {
    %c0 = arith.constant 0 : index
    %c0_0 = arith.constant 0 : index
    %0 = vector.load %arg1[%c0, %c0_0] : memref<128x1024xf32, #tpu.memory_space<vmem>>, vector<128x1024xf32>
    %c0_1 = arith.constant 0 : index
    %c0_2 = arith.constant 0 : index
    %1 = vector.load %arg3[%c0_1, %c0_2] : memref<128x1024xf32, #tpu.memory_space<vmem>>, vector<128x1024xf32>
    %2 = arith.addf %0, %1 : vector<128x1024xf32>
    %cst = arith.constant 2.000000e+00 : f32
    %3 = vector.broadcast %cst : f32 to vector<128x1024xf32>
    %4 = arith.mulf %3, %2 : vector<128x1024xf32>
    %c0_3 = arith.constant 0 : index
    %c0_4 = arith.constant 0 : index
    %5 = vector.load %arg2[%c0_3, %c0_4] : memref<128x1024xf32, #tpu.memory_space<vmem>>, vector<128x1024xf32>
    %6 = arith.addf %4, %5 : vector<128x1024xf32>
    %c0_5 = arith.constant 0 : index
    %c0_6 = arith.constant 0 : index
    %7 = vector.load %arg4[%c0_5, %c0_6] : memref<128x1024xf32, #tpu.memory_space<vmem>>, vector<128x1024xf32>
    tpu.vector_store %arg4[%c0_5, %c0_6], %6 {strides = array<i32>} : memref<128x1024xf32, #tpu.memory_space<vmem>>, vector<128x1024xf32>,
    return
  }
  func.func @transform_0(%arg0: i32) -> (i32, i32) {
    %c0_i32 = arith.constant 0 : i32
    %c0_i32_0 = arith.constant 0 : i32
    return %arg0, %c0_i32 : i32, i32
  }
  func.func @transform_1(%arg0: i32) -> (i32, i32) {
    %c0_i32 = arith.constant 0 : i32
    %c0_i32_0 = arith.constant 0 : i32
    return %arg0, %c0_i32 : i32, i32
  }
  func.func @transform_2(%arg0: i32) -> (i32, i32) {
    %c0_i32 = arith.constant 0 : i32
    %c0_i32_0 = arith.constant 0 : i32
    return %arg0, %c0_i32 : i32, i32
  }
  func.func @transform_3(%arg0: i32) -> (i32, i32) {
    %c0_i32 = arith.constant 0 : i32
    %c0_i32_0 = arith.constant 0 : i32
    return %arg0, %c0_i32 : i32, i32
  }
}

</mosaic_0001>

<bundles_post_ra>
// kernel: m_forward.1
= control target key start
LH: loop header
LB: loop body
LE: loop exit
PB: predicated region body
PF: predicated region fallthrough
CT: control target
= control target key end

     0   :  { %s2364_s0 = inlined_call_operand.hbm [shape: f32[1024,1024], index: 0, kind: input, shape index: {}]   ;;  %s2365_s1 = inlined_call_operand.hbm [shape: f32[1024,1024], index: 1, kind: input, shape index: {}]   ;;  %s2366_s2 = inlined_call_operand.hbm [shape: f32[1024,1024], index: 2, kind: input, shape index: {}]   ;;  %s2367_s3 = inlined_call_operand.hbm [shape: f32[1024,1024], index: 3, kind: output, shape index: {}]  }
   0x1   :  { %2374 = sst [smem:[#allocation12_spill]] %s2364_s0 }
   0x2   :  { %8 = vsyncpa [#allocation3], 0 }
   0x3   :  { %10 = vsyncpa [#allocation3 + $0x1], 0 }
   0x4   :  { %11 = vsyncpa [#allocation6], 0 }
   0x5   :  { %13 = vsyncpa [#allocation6 + $0x1], 0 }
   0x6   :  { %14 = vsyncpa [#allocation4], 0 }
   0x7   :  { %16 = vsyncpa [#allocation4 + $0x1], 0  ;;  %s1584_s12 = smov 0   ;;  %s1586_s13 = smov 0  }
   0x8   :  { %s1588_s14 = smov 0   ;;  %s1590_s15 = smov 0  }
   0x9 LB: > { %s1605_s16 = sadd.s32 4294967295, %s1554_s15   ;;  %s1300_s17 = sadd.s32 4294967294, %s1554_s15   ;;  %s1554_s15 = sphi %s1590_s15, %s2392_s15   ;;  %s1550_s14 = sphi %s1588_s14, %s2391_s14   ;;  %s1546_s13 = sphi %s1586_s13, %s2390_s13   ;;  %s1542_s12 = sphi %s1584_s12, %s2389_s12  }
   0xa   : > { %s1609_s18 = sadd.s32 1, %s1554_s15   ;;  %s29_s19 = sadd.s32 1, %s1550_s14 }
   0xb   : > { %s26_s20 = ssub.s32 %s1554_s15, %s1609_s18  ;;  %p36_p0 = scmp.ne.s32.totalorder %s1550_s14, %s1546_s13 }
   0xc   : > { %p27_p1 = scmp.eq.s32.totalorder %s26_s20, 0  ;;  %p37_p2 = scmp.eq.s32.totalorder %s1554_s15, 0 }
   0xd   : > { %p42_p3 = scmp.ne.s32.totalorder %s1546_s13, %s1542_s12  ;;  %p43_p4 = scmp.eq.s32.totalorder %s1605_s16, 0 }
   0xe   : > { %s1621_s21 = scalar_select %p27_p1, %s1550_s14, %s29_s19  }
   0xf   : > { %p38_p5 = por %p37_p2, %p36_p0  ;;  %p1623_p6 = por %p43_p4, %p42_p3 }
  0x10   : > { %p118_p7 = scmp.eq.s32.totalorder %s1605_s16, 7  ;;  %p124_p8 = scmp.eq.s32.totalorder %s1300_s17, 7 }
  0x11   : > { %s2375_s22 = scalar_select %p1623_p6, 1, 0 }
  0x12   : > { %p1356_p9 = scmp.lt.s32.totalorder %s1554_s15, 8  ;;  %p1629_p10 = por %p118_p7, %p36_p0 }
  0x13   : > { %p1633_p11 = por %p124_p8, %p42_p3  ;;  %s144_s25 = sand.u32 1, %s1550_s14  }
  0x14   : > { %s2376_s23 = scalar_select %p1629_p10, 1, 0 }
  0x15   : > { %s2377_s24 = scalar_select %p1633_p11, 1, 0 }
  0x16   : > { %s1639_s26 = sshll.u32 %s1554_s15, 14  ;;  %s1643_s27 = sshll.u32 %s144_s25, 10 }
  0x17   : > { %p1645_p12 = pnand %p1356_p9, %p38_p5  ;;  %s166_s29 = sand.u32 1, %s1554_s15  }
  0x18   : > { %s1654_s5 = scalar_lea.hbm %s2365_s1, %s1639_s26  ;;  %s170_s6 = scalar_lea.vmem [#allocation5], %s1643_s27 }
  0x19   : > { %s178_s7 = sshll.u32 %s170_s6, 4  ;;  %s1660_s8 = scalar_lea.sflag [#allocation6], %s166_s29  ;;  %s1657_s7 = int_to_ptr.vmem [resolvable:$true] %s178_s7 }
  0x1a   : > { %s1394_s9 = scalar_lea.hbm %s1654_s5, 16384  ;;  %p1666_p1 = pneg %p1645_p12 }
  0x1b   : > { %p1395_p0 = scmp.ne.s32.totalorder %s1654_s5, %s1394_s9  ;;  %s1399_s19 = scalar_lea.hbm %s2365_s1, 131072 }
  0x1c   : > { %p1400_p4 = scmp.lt.u32.totalorder %s1654_s5, %s2365_s1  ;;  %p1401_p5 = scmp.lt.u32.totalorder %s1399_s19, %s1394_s9 }
  0x1d   : > { %p1397_p2 = pnand %p1666_p1, %p1395_p0  ;;  %p1403_p8 = scmp.lt.u32.totalorder %s1394_s9, %s1654_s5 }
  0x1e   : > { %p1402_p7 = por %p1401_p5, %p1400_p4 }
  0x1f   : > { %p1398_p3 = pneg %p1397_p2 }
  0x20   : > { %p1404_p9 = por %p1403_p8, %p1402_p7 }
  0x22   : > { %p1405_p13 = pnand %p1404_p9, %p1398_p3 }
  0x24   : > { %1408 = shalt.err (!%p1405_p13)
}
  0x25   : > { %s1409_s29 = scalar_lea.vmem %s1657_s7, 16384  ;;  %s1556_s4 = smov [#allocation5]  }
  0x26   : > { %p1410_p0 = scmp.ne.s32.totalorder %s1657_s7, %s1409_s29  ;;  %s1414_s6 = sshll.u32 %s1556_s4, 4  ;;  %s1415_s6 = int_to_ptr.vmem [resolvable:$false] %s1414_s6 }
  0x27   : > { %s1416_s11 = scalar_lea.vmem %s1415_s6, 32768  ;;  %p1417_p10 = scmp.lt.s32.totalorder %s1657_s7, %s1415_s6 }
  0x28   : > { %p1412_p2 = pnand %p1410_p0, %p1666_p1  ;;  %p1418_p6 = scmp.lt.s32.totalorder %s1416_s11, %s1409_s29 }
  0x2a   : > { %p1413_p11 = pneg %p1412_p2  ;;  %p1419_p4 = por %p1418_p6, %p1417_p10 }
  0x2c   : > { %p1420_p5 = pnand %p1419_p4, %p1413_p11 }
  0x2e   : > { %1423 = shalt.err (!%p1420_p5)
}
  0x2f   : > { %s2370_s9 = smov 1024   ;;  %s2372_s17 = smov 64  }
  0x30   : > { %1348 = dma.hbm_to_vmem [thread:$0]  (!%p1645_p12), %s1654_s5, 16384, %s1657_s7, %s1660_s8, %s2370_s9, %s2370_s9, %s2372_s17  }
  0x31   : > { %p208_p6 = scmp.lt.s32.totalorder %s1554_s15, 9  ;;  %s2380_s0 = sld [smem:[#allocation12_spill]] }
  0x32   : > { %p2381_p10 = scmp.ge.s32.totalorder %s1554_s15, 1  ;;  %s148_s4 = scalar_lea.vmem [#allocation2], %s1643_s27 }
  0x33   : > { %s156_s6 = sshll.u32 %s148_s4, 4  ;;  %s1711_s5 = scalar_lea.sflag [#allocation3], %s144_s25  ;;  %s1707_s6 = int_to_ptr.vmem [resolvable:$true] %s156_s6 }
  0x34   : > { %p1702_p11 = pnand %p2381_p10, %p208_p6 }
  0x36   : > { %s2382_s29 = scalar_select %p1702_p11, 1, 0 }
  0x37   : > { %s1698_s30 = scalar_lea.hbm %s2380_s0, %s1639_s26  ;;  %s1429_s20 = scalar_lea.hbm %s2380_s0, 131072 }
  0x38   : > { %s1424_s7 = scalar_lea.hbm %s1698_s30, 16384  ;;  %p1430_p8 = scmp.lt.u32.totalorder %s1698_s30, %s2380_s0 }
  0x39   : > { %p1425_p13 = scmp.ne.s32.totalorder %s1698_s30, %s1424_s7  ;;  %p1431_p9 = scmp.lt.u32.totalorder %s1429_s20, %s1424_s7 }
  0x3a   : > { %p1433_p2 = scmp.lt.u32.totalorder %s1424_s7, %s1698_s30 }
  0x3b   : > { %p1427_p3 = pnand %p1425_p13, %p1666_p1  ;;  %p1432_p0 = por %p1431_p9, %p1430_p8 }
  0x3d   : > { %p1428_p7 = pneg %p1427_p3  ;;  %p1434_p4 = por %p1433_p2, %p1432_p0 }
  0x3f   : > { %p1435_p5 = pnand %p1434_p4, %p1428_p7 }
  0x41   : > { %1438 = shalt.err (!%p1435_p5)
}
  0x42   : > { %s1439_s25 = scalar_lea.vmem %s1707_s6, 16384  ;;  %s1559_s4 = smov [#allocation2]  }
  0x43   : > { %p1440_p6 = scmp.ne.s32.totalorder %s1707_s6, %s1439_s25  ;;  %s1444_s11 = sshll.u32 %s1559_s4, 4  ;;  %s1445_s11 = int_to_ptr.vmem [resolvable:$false] %s1444_s11 }
  0x44   : > { %s1446_s9 = scalar_lea.vmem %s1445_s11, 32768  ;;  %p1447_p3 = scmp.lt.s32.totalorder %s1707_s6, %s1445_s11 }
  0x45   : > { %p1442_p10 = pnand %p1440_p6, %p1666_p1  ;;  %p1448_p11 = scmp.lt.s32.totalorder %s1446_s9, %s1439_s25 }
  0x47   : > { %p1443_p13 = pneg %p1442_p10  ;;  %p1449_p8 = por %p1448_p11, %p1447_p3 }
  0x49   : > { %p1450_p9 = pnand %p1449_p8, %p1443_p13 }
  0x4b   : > { %1453 = shalt.err (!%p1450_p9)
}
  0x4c   : > { %s2383_s17 = smov 64   ;;  %s2384_s7 = smov 1024  }
  0x4d   : > { %1345 = dma.hbm_to_vmem [thread:$0]  (!%p1645_p12), %s1698_s30, 16384, %s1707_s6, %s1711_s5, %s2384_s7, %s2384_s7, %s2383_s17  }
  0x4e   : > { %s1742_s4 = scalar_lea.hbm %s2366_s2, %s1639_s26  ;;  %s192_s25 = scalar_lea.vmem [#allocation7], %s1643_s27 }
  0x4f   : > { %s200_s11 = sshll.u32 %s192_s25, 4  ;;  %s1454_s9 = scalar_lea.hbm %s1742_s4, 16384  ;;  %s1745_s11 = int_to_ptr.vmem [resolvable:$true] %s200_s11 }
  0x50   : > { %p1455_p11 = scmp.ne.s32.totalorder %s1742_s4, %s1454_s9  ;;  %s1459_s6 = scalar_lea.hbm %s2366_s2, 131072 }
  0x51   : > { %p1460_p2 = scmp.lt.u32.totalorder %s1742_s4, %s2366_s2  ;;  %p1461_p4 = scmp.lt.u32.totalorder %s1459_s6, %s1454_s9 }
  0x52   : > { %p1457_p7 = pnand %p1455_p11, %p1666_p1  ;;  %p1463_p6 = scmp.lt.u32.totalorder %s1454_s9, %s1742_s4 }
  0x53   : > { %p1462_p5 = por %p1461_p4, %p1460_p2 }
  0x54   : > { %p1458_p0 = pneg %p1457_p7 }
  0x55   : > { %p1464_p10 = por %p1463_p6, %p1462_p5 }
  0x57   : > { %p1465_p13 = pnand %p1464_p10, %p1458_p0 }
  0x59   : > { %1468 = shalt.err (!%p1465_p13)
}
  0x5a   : > { %s1469_s27 = scalar_lea.vmem %s1745_s11, 16384  ;;  %s1560_s0 = smov [#allocation7]  }
  0x5b   : > { %p1470_p3 = scmp.ne.s32.totalorder %s1745_s11, %s1469_s27  ;;  %s1474_s19 = sshll.u32 %s1560_s0, 4  ;;  %s1475_s19 = int_to_ptr.vmem [resolvable:$false] %s1474_s19 }
  0x5c   : > { %s1476_s20 = scalar_lea.vmem %s1475_s19, 32768  ;;  %p1477_p11 = scmp.lt.s32.totalorder %s1745_s11, %s1475_s19 }
  0x5d   : > { %p1472_p8 = pnand %p1470_p3, %p1666_p1  ;;  %p1478_p7 = scmp.lt.s32.totalorder %s1476_s20, %s1469_s27 }
  0x5f   : > { %p1473_p9 = pneg %p1472_p8  ;;  %p1479_p2 = por %p1478_p7, %p1477_p11 }
  0x61   : > { %p1480_p4 = pnand %p1479_p2, %p1473_p9 }
  0x63   : > { %1483 = shalt.err (!%p1480_p4)
}
  0x64   : > { %1351 = dma.hbm_to_vmem [thread:$0]  (!%p1645_p12), %s1742_s4, 16384, %s1745_s11, %s1660_s8, %s2384_s7, %s2384_s7, %s2383_s17  }
  0x65   : > { %p2385_p1 = scmp.ne.s32.totalorder %s2382_s29, 0 }
  0x66   : > { %s1775_s10 = sand.u32 (!%p2385_p1), 1, %s1546_s13   ;;  %p2386_p0 = scmp.ne.s32.totalorder (!%p2385_p1), %s2375_s22, 0 }
  0x67   : > { %212 = sbr.rel (%p2385_p1) target bundleno = 272 (0x110), region = 32  ;;  %s1778_s25 = sshll.u32 (!%p2385_p1), %s1775_s10, 10 }
  0x68   : > { %s215_s28 = scalar_lea.sflag (!%p2385_p1), [#allocation3], %s1775_s10  ;;  %s1782_s9 = scalar_lea.vmem (!%p2385_p1), [#allocation2], %s1778_s25 }
  0x6e   : > { %1529 = dma.done.wait (%p2386_p0), %s215_s28, 16384  }
  0x6f   : > { %1531 = vsyncadd (%p2386_p0), %s215_s28, 4294950912  ;;  %s223_s8 = sand.u32 1, %s1605_s16   ;;  %s1790_s17 = scalar_lea.vmem [#allocation5], %s1778_s25 }
  0x70   : > { %s224_s29 = scalar_lea.sflag [#allocation6], %s223_s8 }
  0x71   : > { %1533 = dma.done.wait (%p2386_p0), %s224_s29, 32768  }
  0x72   : > { %1535 = vsyncadd (%p2386_p0), %s224_s29, 4294934528  ;;  %v273_v0 = vld [vmem:[%s1782_s9] sm:$0xff]  ;;  %s1798_s7 = scalar_lea.vmem [#allocation7], %s1778_s25  ;;  %v274_v3 = vld [vmem:[%s1782_s9 + $0x8] sm:$0xff]  ;;  %s1819_s22 = scalar_lea.vmem [#allocation8], %s1778_s25 }
  0x73   : > { %v401_v1 = vld [vmem:[%s1798_s7] sm:$0xff]  ;;  %v402_v4 = vld [vmem:[%s1798_s7 + $0x8] sm:$0xff]  ;;  %v275_v7 = vld [vmem:[%s1782_s9 + $0x10] sm:$0xff]  ;;  %s1333_s4 = sshll.u32 %s1605_s16, 14  ;;  %s1184_s11 = sshll.u32 %s1819_s22, 4  ;;  %s2318_s11 = int_to_ptr.vmem [resolvable:$true] %s1184_s11 }
  0x74   : > { %v529_v2 = vadd.f32 %v401_v1, %v273_v0  ;;  %v785_v5 = vld [vmem:[%s1790_s17] sm:$0xff]  ;;  %v530_v6 = vadd.f32 %v402_v4, %v274_v3  ;;  %v403_v8 = vld [vmem:[%s1798_s7 + $0x10] sm:$0xff]  ;;  %v786_v10 = vld [vmem:[%s1790_s17 + $0x8] sm:$0xff]  ;;  %s2316_s5 = scalar_lea.hbm %s2367_s3, %s1333_s4  ;;  %s1170_s16 = scalar_lea.sflag [#allocation4], %s1775_s10 }
  0x75   : > { %v531_v11 = vadd.f32 %v403_v8, %v275_v7  ;;  %v276_v12 = vld [vmem:[%s1782_s9 + $0x18] sm:$0xff]  ;;  %v787_v15 = vld [vmem:[%s1790_s17 + $0x10] sm:$0xff]  ;;  %v277_v17 = vld [vmem:[%s1782_s9 + $0x20] sm:$0xff]  ;;  %s1484_s26 = scalar_lea.vmem %s2318_s11, 16384  ;;  %p2387_p5 = scmp.ne.s32.totalorder %s2376_s23, 0 }
  0x76   : > { %v657_v9 = vmul.f32 2.0, %v529_v2  ;;  %v404_v13 = vld [vmem:[%s1798_s7 + $0x18] sm:$0xff]  ;;  %v658_v14 = vmul.f32 2.0, %v530_v6  ;;  %v405_v18 = vld [vmem:[%s1798_s7 + $0x20] sm:$0xff]  ;;  %v278_v23 = vld [vmem:[%s1782_s9 + $0x28] sm:$0xff]  ;;  %p1485_p12 = scmp.ne.s32.totalorder %s2318_s11, %s1484_s26  ;;  %s1561_s27 = smov [#allocation8]  }
  0x77   : > { %v532_v16 = vadd.f32 %v404_v13, %v276_v12  ;;  %v659_v20 = vmul.f32 2.0, %v531_v11  ;;  %v788_v21 = vld [vmem:[%s1790_s17 + $0x18] sm:$0xff]  ;;  %v533_v22 = vadd.f32 %v405_v18, %v277_v17  ;;  %v406_v24 = vld [vmem:[%s1798_s7 + $0x28] sm:$0xff]  ;;  %v789_v27 = vld [vmem:[%s1790_s17 + $0x20] sm:$0xff]  ;;  %s1488_s0 = sshll.u32 %s1561_s27, 4  ;;  %s1489_s0 = int_to_ptr.vmem [resolvable:$false] %s1488_s0 }
  0x78   : > { %v913_v19 = vadd.f32 %v785_v5, %v657_v9  ;;  %v914_v25 = vadd.f32 %v786_v10, %v658_v14  ;;  %v534_v28 = vadd.f32 %v406_v24, %v278_v23  ;;  %v279_v29 = vld [vmem:[%s1782_s9 + $0x30] sm:$0xff]  ;;  %v790_v33 = vld [vmem:[%s1790_s17 + $0x28] sm:$0xff]  ;;  %v280_v35 = vld [vmem:[%s1782_s9 + $0x38] sm:$0xff]  ;;  %p1486_p6 = pnand %p1485_p12, %p2387_p5  ;;  %s1490_s19 = scalar_lea.vmem %s1489_s0, 32768 }
  0x79   : > { %v660_v26 = vmul.f32 2.0, %v532_v16  ;;  %v407_v30 = vld [vmem:[%s1798_s7 + $0x30] sm:$0xff]  ;;  %v915_v31 = vadd.f32 %v787_v15, %v659_v20  ;;  %v661_v32 = vmul.f32 2.0, %v533_v22  ;;  %v408_v36 = vld [vmem:[%s1798_s7 + $0x38] sm:$0xff]  ;;  %v281_v41 = vld [vmem:[%s1782_s9 + $0x40] sm:$0xff]  ;;  %p1491_p13 = scmp.lt.s32.totalorder %s2318_s11, %s1489_s0  ;;  %p1492_p3 = scmp.lt.s32.totalorder %s1490_s19, %s1484_s26 }
  0x7a   : > { %1041 = vst [vmem:[%s1819_s22] sm:$0xff] %v913_v19  ;;  %v535_v34 = vadd.f32 %v407_v30, %v279_v29  ;;  %1042 = vst [vmem:[%s1819_s22 + $0x8] sm:$0xff] %v914_v25  ;;  %v662_v38 = vmul.f32 2.0, %v534_v28  ;;  %v791_v39 = vld [vmem:[%s1790_s17 + $0x30] sm:$0xff]  ;;  %v536_v40 = vadd.f32 %v408_v36, %v280_v35  ;;  %v409_v42 = vld [vmem:[%s1798_s7 + $0x40] sm:$0xff]  ;;  %p1487_p10 = pneg %p1486_p6 }
  0x7b   : > { %v916_v37 = vadd.f32 %v788_v21, %v660_v26  ;;  %1043 = vst [vmem:[%s1819_s22 + $0x10] sm:$0xff] %v915_v31  ;;  %v917_v43 = vadd.f32 %v789_v27, %v661_v32  ;;  %v792_v45 = vld [vmem:[%s1790_s17 + $0x38] sm:$0xff]  ;;  %v537_v46 = vadd.f32 %v409_v42, %v281_v41  ;;  %v282_v47 = vld [vmem:[%s1782_s9 + $0x48] sm:$0xff]  ;;  %v793_v51 = vld [vmem:[%s1790_s17 + $0x40] sm:$0xff]  ;;  %p1493_p8 = por %p1492_p3, %p1491_p13 }
  0x7c   : > { %v663_v44 = vmul.f32 2.0, %v535_v34  ;;  %v410_v48 = vld [vmem:[%s1798_s7 + $0x48] sm:$0xff]  ;;  %v918_v49 = vadd.f32 %v790_v33, %v662_v38  ;;  %v664_v50 = vmul.f32 2.0, %v536_v40  ;;  %v283_v53 = vld [vmem:[%s1782_s9 + $0x50] sm:$0xff]  ;;  %v284_v59 = vld [vmem:[%s1782_s9 + $0x58] sm:$0xff] }
  0x7d   : > { %1044 = vst [vmem:[%s1819_s22 + $0x18] sm:$0xff] %v916_v37  ;;  %v538_v52 = vadd.f32 %v410_v48, %v282_v47  ;;  %v411_v54 = vld [vmem:[%s1798_s7 + $0x50] sm:$0xff]  ;;  %1045 = vst [vmem:[%s1819_s22 + $0x20] sm:$0xff] %v917_v43  ;;  %v665_v56 = vmul.f32 2.0, %v537_v46  ;;  %v794_v57 = vld [vmem:[%s1790_s17 + $0x48] sm:$0xff]  ;;  %p1494_p9 = pnand %p1493_p8, %p1487_p10 }
  0x7e   : > { %v919_v55 = vadd.f32 %v791_v39, %v663_v44  ;;  %v539_v58 = vadd.f32 %v411_v54, %v283_v53  ;;  %v412_v60 = vld [vmem:[%s1798_s7 + $0x58] sm:$0xff]  ;;  %1046 = vst [vmem:[%s1819_s22 + $0x28] sm:$0xff] %v918_v49  ;;  %v920_v61 = vadd.f32 %v792_v45, %v664_v50  ;;  %v795_v63 = vld [vmem:[%s1790_s17 + $0x50] sm:$0xff]  ;;  %v285_v1 = vld [vmem:[%s1782_s9 + $0x60] sm:$0xff] }
  0x7f   : > { %v666_v62 = vmul.f32 2.0, %v538_v52  ;;  %v540_v0 = vadd.f32 %v412_v60, %v284_v59  ;;  %v413_v2 = vld [vmem:[%s1798_s7 + $0x60] sm:$0xff]  ;;  %v921_v3 = vadd.f32 %v793_v51, %v665_v56  ;;  %v796_v5 = vld [vmem:[%s1790_s17 + $0x58] sm:$0xff]  ;;  %v286_v7 = vld [vmem:[%s1782_s9 + $0x68] sm:$0xff] }
  0x80   : > { %1047 = vst [vmem:[%s1819_s22 + $0x30] sm:$0xff] %v919_v55  ;;  %v667_v4 = vmul.f32 2.0, %v539_v58  ;;  %v541_v6 = vadd.f32 %v413_v2, %v285_v1  ;;  %v414_v8 = vld [vmem:[%s1798_s7 + $0x68] sm:$0xff]  ;;  %1048 = vst [vmem:[%s1819_s22 + $0x38] sm:$0xff] %v920_v61  ;;  %v797_v11 = vld [vmem:[%s1790_s17 + $0x60] sm:$0xff] }
  0x81   : > { %v922_v9 = vadd.f32 %v794_v57, %v666_v62  ;;  %v668_v10 = vmul.f32 2.0, %v540_v0  ;;  %v542_v12 = vadd.f32 %v414_v8, %v286_v7  ;;  %v287_v13 = vld [vmem:[%s1782_s9 + $0x70] sm:$0xff]  ;;  %1049 = vst [vmem:[%s1819_s22 + $0x40] sm:$0xff] %v921_v3  ;;  %v798_v17 = vld [vmem:[%s1790_s17 + $0x68] sm:$0xff]  ;;  %v288_v19 = vld [vmem:[%s1782_s9 + $0x78] sm:$0xff] }
  0x82   : > { %v415_v14 = vld [vmem:[%s1798_s7 + $0x70] sm:$0xff]  ;;  %v923_v15 = vadd.f32 %v795_v63, %v667_v4  ;;  %v669_v16 = vmul.f32 2.0, %v541_v6  ;;  %v416_v20 = vld [vmem:[%s1798_s7 + $0x78] sm:$0xff]  ;;  %v289_v25 = vld [vmem:[%s1782_s9 + $0x80] sm:$0xff] }
  0x83   : > { %v543_v18 = vadd.f32 %v415_v14, %v287_v13  ;;  %1050 = vst [vmem:[%s1819_s22 + $0x48] sm:$0xff] %v922_v9  ;;  %v924_v21 = vadd.f32 %v796_v5, %v668_v10  ;;  %v670_v22 = vmul.f32 2.0, %v542_v12  ;;  %v799_v23 = vld [vmem:[%s1790_s17 + $0x70] sm:$0xff]  ;;  %v544_v24 = vadd.f32 %v416_v20, %v288_v19  ;;  %v417_v26 = vld [vmem:[%s1798_s7 + $0x80] sm:$0xff]  ;;  %v800_v29 = vld [vmem:[%s1790_s17 + $0x78] sm:$0xff] }
  0x84   : > { %1051 = vst [vmem:[%s1819_s22 + $0x50] sm:$0xff] %v923_v15  ;;  %v925_v27 = vadd.f32 %v797_v11, %v669_v16  ;;  %v545_v30 = vadd.f32 %v417_v26, %v289_v25  ;;  %v290_v31 = vld [vmem:[%s1782_s9 + $0x88] sm:$0xff]  ;;  %v801_v35 = vld [vmem:[%s1790_s17 + $0x80] sm:$0xff]  ;;  %v291_v37 = vld [vmem:[%s1782_s9 + $0x90] sm:$0xff] }
  0x85   : > { %v671_v28 = vmul.f32 2.0, %v543_v18  ;;  %v418_v32 = vld [vmem:[%s1798_s7 + $0x88] sm:$0xff]  ;;  %1052 = vst [vmem:[%s1819_s22 + $0x58] sm:$0xff] %v924_v21  ;;  %v926_v33 = vadd.f32 %v798_v17, %v670_v22  ;;  %v672_v34 = vmul.f32 2.0, %v544_v24  ;;  %v419_v38 = vld [vmem:[%s1798_s7 + $0x90] sm:$0xff]  ;;  %v292_v43 = vld [vmem:[%s1782_s9 + $0x98] sm:$0xff] }
  0x86   : > { %v546_v36 = vadd.f32 %v418_v32, %v290_v31  ;;  %1053 = vst [vmem:[%s1819_s22 + $0x60] sm:$0xff] %v925_v27  ;;  %v673_v40 = vmul.f32 2.0, %v545_v30  ;;  %v802_v41 = vld [vmem:[%s1790_s17 + $0x88] sm:$0xff]  ;;  %v547_v42 = vadd.f32 %v419_v38, %v291_v37  ;;  %v420_v44 = vld [vmem:[%s1798_s7 + $0x98] sm:$0xff]  ;;  %v803_v47 = vld [vmem:[%s1790_s17 + $0x90] sm:$0xff] }
  0x87   : > { %v927_v39 = vadd.f32 %v799_v23, %v671_v28  ;;  %1054 = vst [vmem:[%s1819_s22 + $0x68] sm:$0xff] %v926_v33  ;;  %v928_v45 = vadd.f32 %v800_v29, %v672_v34  ;;  %v548_v48 = vadd.f32 %v420_v44, %v292_v43  ;;  %v293_v49 = vld [vmem:[%s1782_s9 + $0xa0] sm:$0xff]  ;;  %v804_v53 = vld [vmem:[%s1790_s17 + $0x98] sm:$0xff]  ;;  %v294_v55 = vld [vmem:[%s1782_s9 + $0xa8] sm:$0xff] }
  0x88   : > { %v674_v46 = vmul.f32 2.0, %v546_v36  ;;  %v421_v50 = vld [vmem:[%s1798_s7 + $0xa0] sm:$0xff]  ;;  %v929_v51 = vadd.f32 %v801_v35, %v673_v40  ;;  %v675_v52 = vmul.f32 2.0, %v547_v42  ;;  %v422_v56 = vld [vmem:[%s1798_s7 + $0xa8] sm:$0xff]  ;;  %v295_v61 = vld [vmem:[%s1782_s9 + $0xb0] sm:$0xff] }
  0x89   : > { %1055 = vst [vmem:[%s1819_s22 + $0x70] sm:$0xff] %v927_v39  ;;  %v549_v54 = vadd.f32 %v421_v50, %v293_v49  ;;  %1056 = vst [vmem:[%s1819_s22 + $0x78] sm:$0xff] %v928_v45  ;;  %v676_v58 = vmul.f32 2.0, %v548_v48  ;;  %v805_v59 = vld [vmem:[%s1790_s17 + $0xa0] sm:$0xff]  ;;  %v550_v60 = vadd.f32 %v422_v56, %v294_v55  ;;  %v423_v62 = vld [vmem:[%s1798_s7 + $0xb0] sm:$0xff] }
  0x8a   : > { %v930_v57 = vadd.f32 %v802_v41, %v674_v46  ;;  %1057 = vst [vmem:[%s1819_s22 + $0x80] sm:$0xff] %v929_v51  ;;  %v931_v63 = vadd.f32 %v803_v47, %v675_v52  ;;  %v806_v1 = vld [vmem:[%s1790_s17 + $0xa8] sm:$0xff]  ;;  %v551_v2 = vadd.f32 %v423_v62, %v295_v61  ;;  %v296_v3 = vld [vmem:[%s1782_s9 + $0xb8] sm:$0xff]  ;;  %v807_v7 = vld [vmem:[%s1790_s17 + $0xb0] sm:$0xff] }
  0x8b   : > { %v677_v0 = vmul.f32 2.0, %v549_v54  ;;  %v424_v4 = vld [vmem:[%s1798_s7 + $0xb8] sm:$0xff]  ;;  %v932_v5 = vadd.f32 %v804_v53, %v676_v58  ;;  %v678_v6 = vmul.f32 2.0, %v550_v60  ;;  %v297_v9 = vld [vmem:[%s1782_s9 + $0xc0] sm:$0xff]  ;;  %v298_v15 = vld [vmem:[%s1782_s9 + $0xc8] sm:$0xff] }
  0x8c   : > { %1058 = vst [vmem:[%s1819_s22 + $0x88] sm:$0xff] %v930_v57  ;;  %v552_v8 = vadd.f32 %v424_v4, %v296_v3  ;;  %v425_v10 = vld [vmem:[%s1798_s7 + $0xc0] sm:$0xff]  ;;  %1059 = vst [vmem:[%s1819_s22 + $0x90] sm:$0xff] %v931_v63  ;;  %v679_v12 = vmul.f32 2.0, %v551_v2  ;;  %v808_v13 = vld [vmem:[%s1790_s17 + $0xb8] sm:$0xff] }
  0x8d   : > { %v933_v11 = vadd.f32 %v805_v59, %v677_v0  ;;  %v553_v14 = vadd.f32 %v425_v10, %v297_v9  ;;  %v426_v16 = vld [vmem:[%s1798_s7 + $0xc8] sm:$0xff]  ;;  %1060 = vst [vmem:[%s1819_s22 + $0x98] sm:$0xff] %v932_v5  ;;  %v934_v17 = vadd.f32 %v806_v1, %v678_v6  ;;  %v809_v19 = vld [vmem:[%s1790_s17 + $0xc0] sm:$0xff]  ;;  %v299_v21 = vld [vmem:[%s1782_s9 + $0xd0] sm:$0xff] }
  0x8e   : > { %v680_v18 = vmul.f32 2.0, %v552_v8  ;;  %v554_v20 = vadd.f32 %v426_v16, %v298_v15  ;;  %v427_v22 = vld [vmem:[%s1798_s7 + $0xd0] sm:$0xff]  ;;  %v935_v23 = vadd.f32 %v807_v7, %v679_v12  ;;  %v810_v25 = vld [vmem:[%s1790_s17 + $0xc8] sm:$0xff]  ;;  %v300_v27 = vld [vmem:[%s1782_s9 + $0xd8] sm:$0xff] }
  0x8f   : > { %1061 = vst [vmem:[%s1819_s22 + $0xa0] sm:$0xff] %v933_v11  ;;  %v681_v24 = vmul.f32 2.0, %v553_v14  ;;  %v555_v26 = vadd.f32 %v427_v22, %v299_v21  ;;  %v428_v28 = vld [vmem:[%s1798_s7 + $0xd8] sm:$0xff]  ;;  %1062 = vst [vmem:[%s1819_s22 + $0xa8] sm:$0xff] %v934_v17  ;;  %v811_v31 = vld [vmem:[%s1790_s17 + $0xd0] sm:$0xff] }
  0x90   : > { %v936_v29 = vadd.f32 %v808_v13, %v680_v18  ;;  %v682_v30 = vmul.f32 2.0, %v554_v20  ;;  %v556_v32 = vadd.f32 %v428_v28, %v300_v27  ;;  %v301_v33 = vld [vmem:[%s1782_s9 + $0xe0] sm:$0xff]  ;;  %1063 = vst [vmem:[%s1819_s22 + $0xb0] sm:$0xff] %v935_v23  ;;  %v812_v37 = vld [vmem:[%s1790_s17 + $0xd8] sm:$0xff]  ;;  %v302_v39 = vld [vmem:[%s1782_s9 + $0xe8] sm:$0xff] }
  0x91   : > { %v429_v34 = vld [vmem:[%s1798_s7 + $0xe0] sm:$0xff]  ;;  %v937_v35 = vadd.f32 %v809_v19, %v681_v24  ;;  %v683_v36 = vmul.f32 2.0, %v555_v26  ;;  %v430_v40 = vld [vmem:[%s1798_s7 + $0xe8] sm:$0xff]  ;;  %v303_v45 = vld [vmem:[%s1782_s9 + $0xf0] sm:$0xff] }
  0x92   : > { %v557_v38 = vadd.f32 %v429_v34, %v301_v33  ;;  %1064 = vst [vmem:[%s1819_s22 + $0xb8] sm:$0xff] %v936_v29  ;;  %v938_v41 = vadd.f32 %v810_v25, %v682_v30  ;;  %v684_v42 = vmul.f32 2.0, %v556_v32  ;;  %v813_v43 = vld [vmem:[%s1790_s17 + $0xe0] sm:$0xff]  ;;  %v558_v44 = vadd.f32 %v430_v40, %v302_v39  ;;  %v431_v46 = vld [vmem:[%s1798_s7 + $0xf0] sm:$0xff]  ;;  %v814_v49 = vld [vmem:[%s1790_s17 + $0xe8] sm:$0xff] }
  0x93   : > { %1065 = vst [vmem:[%s1819_s22 + $0xc0] sm:$0xff] %v937_v35  ;;  %v939_v47 = vadd.f32 %v811_v31, %v683_v36  ;;  %v559_v50 = vadd.f32 %v431_v46, %v303_v45  ;;  %v304_v51 = vld [vmem:[%s1782_s9 + $0xf8] sm:$0xff]  ;;  %v815_v55 = vld [vmem:[%s1790_s17 + $0xf0] sm:$0xff]  ;;  %v305_v57 = vld [vmem:[%s1782_s9 + $0x100] sm:$0xff] }
  0x94   : > { %v685_v48 = vmul.f32 2.0, %v557_v38  ;;  %v432_v52 = vld [vmem:[%s1798_s7 + $0xf8] sm:$0xff]  ;;  %1066 = vst [vmem:[%s1819_s22 + $0xc8] sm:$0xff] %v938_v41  ;;  %v940_v53 = vadd.f32 %v812_v37, %v684_v42  ;;  %v686_v54 = vmul.f32 2.0, %v558_v44  ;;  %v433_v58 = vld [vmem:[%s1798_s7 + $0x100] sm:$0xff]  ;;  %v306_v63 = vld [vmem:[%s1782_s9 + $0x108] sm:$0xff] }
  0x95   : > { %v560_v56 = vadd.f32 %v432_v52, %v304_v51  ;;  %1067 = vst [vmem:[%s1819_s22 + $0xd0] sm:$0xff] %v939_v47  ;;  %v687_v60 = vmul.f32 2.0, %v559_v50  ;;  %v816_v61 = vld [vmem:[%s1790_s17 + $0xf8] sm:$0xff]  ;;  %v561_v62 = vadd.f32 %v433_v58, %v305_v57  ;;  %v434_v0 = vld [vmem:[%s1798_s7 + $0x108] sm:$0xff]  ;;  %v817_v3 = vld [vmem:[%s1790_s17 + $0x100] sm:$0xff] }
  0x96   : > { %v941_v59 = vadd.f32 %v813_v43, %v685_v48  ;;  %1068 = vst [vmem:[%s1819_s22 + $0xd8] sm:$0xff] %v940_v53  ;;  %v942_v1 = vadd.f32 %v814_v49, %v686_v54  ;;  %v562_v4 = vadd.f32 %v434_v0, %v306_v63  ;;  %v307_v5 = vld [vmem:[%s1782_s9 + $0x110] sm:$0xff]  ;;  %v818_v9 = vld [vmem:[%s1790_s17 + $0x108] sm:$0xff]  ;;  %v308_v11 = vld [vmem:[%s1782_s9 + $0x118] sm:$0xff] }
  0x97   : > { %v688_v2 = vmul.f32 2.0, %v560_v56  ;;  %v435_v6 = vld [vmem:[%s1798_s7 + $0x110] sm:$0xff]  ;;  %v943_v7 = vadd.f32 %v815_v55, %v687_v60  ;;  %v689_v8 = vmul.f32 2.0, %v561_v62  ;;  %v436_v12 = vld [vmem:[%s1798_s7 + $0x118] sm:$0xff]  ;;  %v309_v17 = vld [vmem:[%s1782_s9 + $0x120] sm:$0xff] }
  0x98   : > { %1069 = vst [vmem:[%s1819_s22 + $0xe0] sm:$0xff] %v941_v59  ;;  %v563_v10 = vadd.f32 %v435_v6, %v307_v5  ;;  %1070 = vst [vmem:[%s1819_s22 + $0xe8] sm:$0xff] %v942_v1  ;;  %v690_v14 = vmul.f32 2.0, %v562_v4  ;;  %v819_v15 = vld [vmem:[%s1790_s17 + $0x110] sm:$0xff]  ;;  %v564_v16 = vadd.f32 %v436_v12, %v308_v11  ;;  %v437_v18 = vld [vmem:[%s1798_s7 + $0x120] sm:$0xff] }
  0x99   : > { %v944_v13 = vadd.f32 %v816_v61, %v688_v2  ;;  %1071 = vst [vmem:[%s1819_s22 + $0xf0] sm:$0xff] %v943_v7  ;;  %v945_v19 = vadd.f32 %v817_v3, %v689_v8  ;;  %v820_v21 = vld [vmem:[%s1790_s17 + $0x118] sm:$0xff]  ;;  %v565_v22 = vadd.f32 %v437_v18, %v309_v17  ;;  %v310_v23 = vld [vmem:[%s1782_s9 + $0x128] sm:$0xff]  ;;  %v821_v27 = vld [vmem:[%s1790_s17 + $0x120] sm:$0xff] }
  0x9a   : > { %v691_v20 = vmul.f32 2.0, %v563_v10  ;;  %v438_v24 = vld [vmem:[%s1798_s7 + $0x128] sm:$0xff]  ;;  %v946_v25 = vadd.f32 %v818_v9, %v690_v14  ;;  %v692_v26 = vmul.f32 2.0, %v564_v16  ;;  %v311_v29 = vld [vmem:[%s1782_s9 + $0x130] sm:$0xff]  ;;  %v312_v35 = vld [vmem:[%s1782_s9 + $0x138] sm:$0xff] }
  0x9b   : > { %1072 = vst [vmem:[%s1819_s22 + $0xf8] sm:$0xff] %v944_v13  ;;  %v566_v28 = vadd.f32 %v438_v24, %v310_v23  ;;  %v439_v30 = vld [vmem:[%s1798_s7 + $0x130] sm:$0xff]  ;;  %1073 = vst [vmem:[%s1819_s22 + $0x100] sm:$0xff] %v945_v19  ;;  %v693_v32 = vmul.f32 2.0, %v565_v22  ;;  %v822_v33 = vld [vmem:[%s1790_s17 + $0x128] sm:$0xff] }
  0x9c   : > { %v947_v31 = vadd.f32 %v819_v15, %v691_v20  ;;  %v567_v34 = vadd.f32 %v439_v30, %v311_v29  ;;  %v440_v36 = vld [vmem:[%s1798_s7 + $0x138] sm:$0xff]  ;;  %1074 = vst [vmem:[%s1819_s22 + $0x108] sm:$0xff] %v946_v25  ;;  %v948_v37 = vadd.f32 %v820_v21, %v692_v26  ;;  %v823_v39 = vld [vmem:[%s1790_s17 + $0x130] sm:$0xff]  ;;  %v313_v41 = vld [vmem:[%s1782_s9 + $0x140] sm:$0xff] }
  0x9d   : > { %v694_v38 = vmul.f32 2.0, %v566_v28  ;;  %v568_v40 = vadd.f32 %v440_v36, %v312_v35  ;;  %v441_v42 = vld [vmem:[%s1798_s7 + $0x140] sm:$0xff]  ;;  %v949_v43 = vadd.f32 %v821_v27, %v693_v32  ;;  %v824_v45 = vld [vmem:[%s1790_s17 + $0x138] sm:$0xff]  ;;  %v314_v47 = vld [vmem:[%s1782_s9 + $0x148] sm:$0xff] }
  0x9e   : > { %1075 = vst [vmem:[%s1819_s22 + $0x110] sm:$0xff] %v947_v31  ;;  %v695_v44 = vmul.f32 2.0, %v567_v34  ;;  %v569_v46 = vadd.f32 %v441_v42, %v313_v41  ;;  %v442_v48 = vld [vmem:[%s1798_s7 + $0x148] sm:$0xff]  ;;  %1076 = vst [vmem:[%s1819_s22 + $0x118] sm:$0xff] %v948_v37  ;;  %v825_v51 = vld [vmem:[%s1790_s17 + $0x140] sm:$0xff] }
  0x9f   : > { %v950_v49 = vadd.f32 %v822_v33, %v694_v38  ;;  %v696_v50 = vmul.f32 2.0, %v568_v40  ;;  %v570_v52 = vadd.f32 %v442_v48, %v314_v47  ;;  %v315_v53 = vld [vmem:[%s1782_s9 + $0x150] sm:$0xff]  ;;  %1077 = vst [vmem:[%s1819_s22 + $0x120] sm:$0xff] %v949_v43  ;;  %v826_v57 = vld [vmem:[%s1790_s17 + $0x148] sm:$0xff]  ;;  %v316_v59 = vld [vmem:[%s1782_s9 + $0x158] sm:$0xff] }
  0xa0   : > { %v443_v54 = vld [vmem:[%s1798_s7 + $0x150] sm:$0xff]  ;;  %v951_v55 = vadd.f32 %v823_v39, %v695_v44  ;;  %v697_v56 = vmul.f32 2.0, %v569_v46  ;;  %v444_v60 = vld [vmem:[%s1798_s7 + $0x158] sm:$0xff]  ;;  %v317_v1 = vld [vmem:[%s1782_s9 + $0x160] sm:$0xff] }
  0xa1   : > { %v571_v58 = vadd.f32 %v443_v54, %v315_v53  ;;  %1078 = vst [vmem:[%s1819_s22 + $0x128] sm:$0xff] %v950_v49  ;;  %v952_v61 = vadd.f32 %v824_v45, %v696_v50  ;;  %v698_v62 = vmul.f32 2.0, %v570_v52  ;;  %v827_v63 = vld [vmem:[%s1790_s17 + $0x150] sm:$0xff]  ;;  %v572_v0 = vadd.f32 %v444_v60, %v316_v59  ;;  %v445_v2 = vld [vmem:[%s1798_s7 + $0x160] sm:$0xff]  ;;  %v828_v5 = vld [vmem:[%s1790_s17 + $0x158] sm:$0xff] }
  0xa2   : > { %1079 = vst [vmem:[%s1819_s22 + $0x130] sm:$0xff] %v951_v55  ;;  %v953_v3 = vadd.f32 %v825_v51, %v697_v56  ;;  %v573_v6 = vadd.f32 %v445_v2, %v317_v1  ;;  %v318_v7 = vld [vmem:[%s1782_s9 + $0x168] sm:$0xff]  ;;  %v829_v11 = vld [vmem:[%s1790_s17 + $0x160] sm:$0xff]  ;;  %v319_v13 = vld [vmem:[%s1782_s9 + $0x170] sm:$0xff] }
  0xa3   : > { %v699_v4 = vmul.f32 2.0, %v571_v58  ;;  %v446_v8 = vld [vmem:[%s1798_s7 + $0x168] sm:$0xff]  ;;  %1080 = vst [vmem:[%s1819_s22 + $0x138] sm:$0xff] %v952_v61  ;;  %v954_v9 = vadd.f32 %v826_v57, %v698_v62  ;;  %v700_v10 = vmul.f32 2.0, %v572_v0  ;;  %v447_v14 = vld [vmem:[%s1798_s7 + $0x170] sm:$0xff]  ;;  %v320_v19 = vld [vmem:[%s1782_s9 + $0x178] sm:$0xff] }
  0xa4   : > { %v574_v12 = vadd.f32 %v446_v8, %v318_v7  ;;  %1081 = vst [vmem:[%s1819_s22 + $0x140] sm:$0xff] %v953_v3  ;;  %v701_v16 = vmul.f32 2.0, %v573_v6  ;;  %v830_v17 = vld [vmem:[%s1790_s17 + $0x168] sm:$0xff]  ;;  %v575_v18 = vadd.f32 %v447_v14, %v319_v13  ;;  %v448_v20 = vld [vmem:[%s1798_s7 + $0x178] sm:$0xff]  ;;  %v831_v23 = vld [vmem:[%s1790_s17 + $0x170] sm:$0xff] }
  0xa5   : > { %v955_v15 = vadd.f32 %v827_v63, %v699_v4  ;;  %1082 = vst [vmem:[%s1819_s22 + $0x148] sm:$0xff] %v954_v9  ;;  %v956_v21 = vadd.f32 %v828_v5, %v700_v10  ;;  %v576_v24 = vadd.f32 %v448_v20, %v320_v19  ;;  %v321_v25 = vld [vmem:[%s1782_s9 + $0x180] sm:$0xff]  ;;  %v832_v29 = vld [vmem:[%s1790_s17 + $0x178] sm:$0xff]  ;;  %v322_v31 = vld [vmem:[%s1782_s9 + $0x188] sm:$0xff] }
  0xa6   : > { %v702_v22 = vmul.f32 2.0, %v574_v12  ;;  %v449_v26 = vld [vmem:[%s1798_s7 + $0x180] sm:$0xff]  ;;  %v957_v27 = vadd.f32 %v829_v11, %v701_v16  ;;  %v703_v28 = vmul.f32 2.0, %v575_v18  ;;  %v450_v32 = vld [vmem:[%s1798_s7 + $0x188] sm:$0xff]  ;;  %v323_v37 = vld [vmem:[%s1782_s9 + $0x190] sm:$0xff] }
  0xa7   : > { %1083 = vst [vmem:[%s1819_s22 + $0x150] sm:$0xff] %v955_v15  ;;  %v577_v30 = vadd.f32 %v449_v26, %v321_v25  ;;  %1084 = vst [vmem:[%s1819_s22 + $0x158] sm:$0xff] %v956_v21  ;;  %v704_v34 = vmul.f32 2.0, %v576_v24  ;;  %v833_v35 = vld [vmem:[%s1790_s17 + $0x180] sm:$0xff]  ;;  %v578_v36 = vadd.f32 %v450_v32, %v322_v31  ;;  %v451_v38 = vld [vmem:[%s1798_s7 + $0x190] sm:$0xff] }
  0xa8   : > { %v958_v33 = vadd.f32 %v830_v17, %v702_v22  ;;  %1085 = vst [vmem:[%s1819_s22 + $0x160] sm:$0xff] %v957_v27  ;;  %v959_v39 = vadd.f32 %v831_v23, %v703_v28  ;;  %v834_v41 = vld [vmem:[%s1790_s17 + $0x188] sm:$0xff]  ;;  %v579_v42 = vadd.f32 %v451_v38, %v323_v37  ;;  %v324_v43 = vld [vmem:[%s1782_s9 + $0x198] sm:$0xff]  ;;  %v835_v47 = vld [vmem:[%s1790_s17 + $0x190] sm:$0xff] }
  0xa9   : > { %v705_v40 = vmul.f32 2.0, %v577_v30  ;;  %v452_v44 = vld [vmem:[%s1798_s7 + $0x198] sm:$0xff]  ;;  %v960_v45 = vadd.f32 %v832_v29, %v704_v34  ;;  %v706_v46 = vmul.f32 2.0, %v578_v36  ;;  %v325_v49 = vld [vmem:[%s1782_s9 + $0x1a0] sm:$0xff]  ;;  %v326_v55 = vld [vmem:[%s1782_s9 + $0x1a8] sm:$0xff] }
  0xaa   : > { %1086 = vst [vmem:[%s1819_s22 + $0x168] sm:$0xff] %v958_v33  ;;  %v580_v48 = vadd.f32 %v452_v44, %v324_v43  ;;  %v453_v50 = vld [vmem:[%s1798_s7 + $0x1a0] sm:$0xff]  ;;  %1087 = vst [vmem:[%s1819_s22 + $0x170] sm:$0xff] %v959_v39  ;;  %v707_v52 = vmul.f32 2.0, %v579_v42  ;;  %v836_v53 = vld [vmem:[%s1790_s17 + $0x198] sm:$0xff] }
  0xab   : > { %v961_v51 = vadd.f32 %v833_v35, %v705_v40  ;;  %v581_v54 = vadd.f32 %v453_v50, %v325_v49  ;;  %v454_v56 = vld [vmem:[%s1798_s7 + $0x1a8] sm:$0xff]  ;;  %1088 = vst [vmem:[%s1819_s22 + $0x178] sm:$0xff] %v960_v45  ;;  %v962_v57 = vadd.f32 %v834_v41, %v706_v46  ;;  %v837_v59 = vld [vmem:[%s1790_s17 + $0x1a0] sm:$0xff]  ;;  %v327_v61 = vld [vmem:[%s1782_s9 + $0x1b0] sm:$0xff] }
  0xac   : > { %v708_v58 = vmul.f32 2.0, %v580_v48  ;;  %v582_v60 = vadd.f32 %v454_v56, %v326_v55  ;;  %v455_v62 = vld [vmem:[%s1798_s7 + $0x1b0] sm:$0xff]  ;;  %v963_v63 = vadd.f32 %v835_v47, %v707_v52  ;;  %v838_v1 = vld [vmem:[%s1790_s17 + $0x1a8] sm:$0xff]  ;;  %v328_v3 = vld [vmem:[%s1782_s9 + $0x1b8] sm:$0xff] }
  0xad   : > { %1089 = vst [vmem:[%s1819_s22 + $0x180] sm:$0xff] %v961_v51  ;;  %v709_v0 = vmul.f32 2.0, %v581_v54  ;;  %v583_v2 = vadd.f32 %v455_v62, %v327_v61  ;;  %v456_v4 = vld [vmem:[%s1798_s7 + $0x1b8] sm:$0xff]  ;;  %1090 = vst [vmem:[%s1819_s22 + $0x188] sm:$0xff] %v962_v57  ;;  %v839_v7 = vld [vmem:[%s1790_s17 + $0x1b0] sm:$0xff] }
  0xae   : > { %v964_v5 = vadd.f32 %v836_v53, %v708_v58  ;;  %v710_v6 = vmul.f32 2.0, %v582_v60  ;;  %v584_v8 = vadd.f32 %v456_v4, %v328_v3  ;;  %v329_v9 = vld [vmem:[%s1782_s9 + $0x1c0] sm:$0xff]  ;;  %1091 = vst [vmem:[%s1819_s22 + $0x190] sm:$0xff] %v963_v63  ;;  %v840_v13 = vld [vmem:[%s1790_s17 + $0x1b8] sm:$0xff]  ;;  %v330_v15 = vld [vmem:[%s1782_s9 + $0x1c8] sm:$0xff] }
  0xaf   : > { %v457_v10 = vld [vmem:[%s1798_s7 + $0x1c0] sm:$0xff]  ;;  %v965_v11 = vadd.f32 %v837_v59, %v709_v0  ;;  %v711_v12 = vmul.f32 2.0, %v583_v2  ;;  %v458_v16 = vld [vmem:[%s1798_s7 + $0x1c8] sm:$0xff]  ;;  %v331_v21 = vld [vmem:[%s1782_s9 + $0x1d0] sm:$0xff] }
  0xb0   : > { %v585_v14 = vadd.f32 %v457_v10, %v329_v9  ;;  %1092 = vst [vmem:[%s1819_s22 + $0x198] sm:$0xff] %v964_v5  ;;  %v966_v17 = vadd.f32 %v838_v1, %v710_v6  ;;  %v712_v18 = vmul.f32 2.0, %v584_v8  ;;  %v841_v19 = vld [vmem:[%s1790_s17 + $0x1c0] sm:$0xff]  ;;  %v586_v20 = vadd.f32 %v458_v16, %v330_v15  ;;  %v459_v22 = vld [vmem:[%s1798_s7 + $0x1d0] sm:$0xff]  ;;  %v842_v25 = vld [vmem:[%s1790_s17 + $0x1c8] sm:$0xff] }
  0xb1   : > { %1093 = vst [vmem:[%s1819_s22 + $0x1a0] sm:$0xff] %v965_v11  ;;  %v967_v23 = vadd.f32 %v839_v7, %v711_v12  ;;  %v587_v26 = vadd.f32 %v459_v22, %v331_v21  ;;  %v332_v27 = vld [vmem:[%s1782_s9 + $0x1d8] sm:$0xff]  ;;  %v843_v31 = vld [vmem:[%s1790_s17 + $0x1d0] sm:$0xff]  ;;  %v333_v33 = vld [vmem:[%s1782_s9 + $0x1e0] sm:$0xff] }
  0xb2   : > { %v713_v24 = vmul.f32 2.0, %v585_v14  ;;  %v460_v28 = vld [vmem:[%s1798_s7 + $0x1d8] sm:$0xff]  ;;  %1094 = vst [vmem:[%s1819_s22 + $0x1a8] sm:$0xff] %v966_v17  ;;  %v968_v29 = vadd.f32 %v840_v13, %v712_v18  ;;  %v714_v30 = vmul.f32 2.0, %v586_v20  ;;  %v461_v34 = vld [vmem:[%s1798_s7 + $0x1e0] sm:$0xff]  ;;  %v334_v39 = vld [vmem:[%s1782_s9 + $0x1e8] sm:$0xff] }
  0xb3   : > { %v588_v32 = vadd.f32 %v460_v28, %v332_v27  ;;  %1095 = vst [vmem:[%s1819_s22 + $0x1b0] sm:$0xff] %v967_v23  ;;  %v715_v36 = vmul.f32 2.0, %v587_v26  ;;  %v844_v37 = vld [vmem:[%s1790_s17 + $0x1d8] sm:$0xff]  ;;  %v589_v38 = vadd.f32 %v461_v34, %v333_v33  ;;  %v462_v40 = vld [vmem:[%s1798_s7 + $0x1e8] sm:$0xff]  ;;  %v845_v43 = vld [vmem:[%s1790_s17 + $0x1e0] sm:$0xff] }
  0xb4   : > { %v969_v35 = vadd.f32 %v841_v19, %v713_v24  ;;  %1096 = vst [vmem:[%s1819_s22 + $0x1b8] sm:$0xff] %v968_v29  ;;  %v970_v41 = vadd.f32 %v842_v25, %v714_v30  ;;  %v590_v44 = vadd.f32 %v462_v40, %v334_v39  ;;  %v335_v45 = vld [vmem:[%s1782_s9 + $0x1f0] sm:$0xff]  ;;  %v846_v49 = vld [vmem:[%s1790_s17 + $0x1e8] sm:$0xff]  ;;  %v336_v51 = vld [vmem:[%s1782_s9 + $0x1f8] sm:$0xff] }
  0xb5   : > { %v716_v42 = vmul.f32 2.0, %v588_v32  ;;  %v463_v46 = vld [vmem:[%s1798_s7 + $0x1f0] sm:$0xff]  ;;  %v971_v47 = vadd.f32 %v843_v31, %v715_v36  ;;  %v717_v48 = vmul.f32 2.0, %v589_v38  ;;  %v464_v52 = vld [vmem:[%s1798_s7 + $0x1f8] sm:$0xff]  ;;  %v337_v57 = vld [vmem:[%s1782_s9 + $0x200] sm:$0xff] }
  0xb6   : > { %1097 = vst [vmem:[%s1819_s22 + $0x1c0] sm:$0xff] %v969_v35  ;;  %v591_v50 = vadd.f32 %v463_v46, %v335_v45  ;;  %1098 = vst [vmem:[%s1819_s22 + $0x1c8] sm:$0xff] %v970_v41  ;;  %v718_v54 = vmul.f32 2.0, %v590_v44  ;;  %v847_v55 = vld [vmem:[%s1790_s17 + $0x1f0] sm:$0xff]  ;;  %v592_v56 = vadd.f32 %v464_v52, %v336_v51  ;;  %v465_v58 = vld [vmem:[%s1798_s7 + $0x200] sm:$0xff] }
  0xb7   : > { %v972_v53 = vadd.f32 %v844_v37, %v716_v42  ;;  %1099 = vst [vmem:[%s1819_s22 + $0x1d0] sm:$0xff] %v971_v47  ;;  %v973_v59 = vadd.f32 %v845_v43, %v717_v48  ;;  %v848_v61 = vld [vmem:[%s1790_s17 + $0x1f8] sm:$0xff]  ;;  %v593_v62 = vadd.f32 %v465_v58, %v337_v57  ;;  %v338_v63 = vld [vmem:[%s1782_s9 + $0x208] sm:$0xff]  ;;  %v849_v3 = vld [vmem:[%s1790_s17 + $0x200] sm:$0xff] }
  0xb8   : > { %v719_v60 = vmul.f32 2.0, %v591_v50  ;;  %v466_v0 = vld [vmem:[%s1798_s7 + $0x208] sm:$0xff]  ;;  %v974_v1 = vadd.f32 %v846_v49, %v718_v54  ;;  %v720_v2 = vmul.f32 2.0, %v592_v56  ;;  %v339_v5 = vld [vmem:[%s1782_s9 + $0x210] sm:$0xff]  ;;  %v340_v11 = vld [vmem:[%s1782_s9 + $0x218] sm:$0xff] }
  0xb9   : > { %1100 = vst [vmem:[%s1819_s22 + $0x1d8] sm:$0xff] %v972_v53  ;;  %v594_v4 = vadd.f32 %v466_v0, %v338_v63  ;;  %v467_v6 = vld [vmem:[%s1798_s7 + $0x210] sm:$0xff]  ;;  %1101 = vst [vmem:[%s1819_s22 + $0x1e0] sm:$0xff] %v973_v59  ;;  %v721_v8 = vmul.f32 2.0, %v593_v62  ;;  %v850_v9 = vld [vmem:[%s1790_s17 + $0x208] sm:$0xff] }
  0xba   : > { %v975_v7 = vadd.f32 %v847_v55, %v719_v60  ;;  %v595_v10 = vadd.f32 %v467_v6, %v339_v5  ;;  %v468_v12 = vld [vmem:[%s1798_s7 + $0x218] sm:$0xff]  ;;  %1102 = vst [vmem:[%s1819_s22 + $0x1e8] sm:$0xff] %v974_v1  ;;  %v976_v13 = vadd.f32 %v848_v61, %v720_v2  ;;  %v851_v15 = vld [vmem:[%s1790_s17 + $0x210] sm:$0xff]  ;;  %v341_v17 = vld [vmem:[%s1782_s9 + $0x220] sm:$0xff] }
  0xbb   : > { %v722_v14 = vmul.f32 2.0, %v594_v4  ;;  %v596_v16 = vadd.f32 %v468_v12, %v340_v11  ;;  %v469_v18 = vld [vmem:[%s1798_s7 + $0x220] sm:$0xff]  ;;  %v977_v19 = vadd.f32 %v849_v3, %v721_v8  ;;  %v852_v21 = vld [vmem:[%s1790_s17 + $0x218] sm:$0xff]  ;;  %v342_v23 = vld [vmem:[%s1782_s9 + $0x228] sm:$0xff] }
  0xbc   : > { %1103 = vst [vmem:[%s1819_s22 + $0x1f0] sm:$0xff] %v975_v7  ;;  %v723_v20 = vmul.f32 2.0, %v595_v10  ;;  %v597_v22 = vadd.f32 %v469_v18, %v341_v17  ;;  %v470_v24 = vld [vmem:[%s1798_s7 + $0x228] sm:$0xff]  ;;  %1104 = vst [vmem:[%s1819_s22 + $0x1f8] sm:$0xff] %v976_v13  ;;  %v853_v27 = vld [vmem:[%s1790_s17 + $0x220] sm:$0xff] }
  0xbd   : > { %v978_v25 = vadd.f32 %v850_v9, %v722_v14  ;;  %v724_v26 = vmul.f32 2.0, %v596_v16  ;;  %v598_v28 = vadd.f32 %v470_v24, %v342_v23  ;;  %v343_v29 = vld [vmem:[%s1782_s9 + $0x230] sm:$0xff]  ;;  %1105 = vst [vmem:[%s1819_s22 + $0x200] sm:$0xff] %v977_v19  ;;  %v854_v33 = vld [vmem:[%s1790_s17 + $0x228] sm:$0xff]  ;;  %v344_v35 = vld [vmem:[%s1782_s9 + $0x238] sm:$0xff] }
  0xbe   : > { %v471_v30 = vld [vmem:[%s1798_s7 + $0x230] sm:$0xff]  ;;  %v979_v31 = vadd.f32 %v851_v15, %v723_v20  ;;  %v725_v32 = vmul.f32 2.0, %v597_v22  ;;  %v472_v36 = vld [vmem:[%s1798_s7 + $0x238] sm:$0xff]  ;;  %v345_v41 = vld [vmem:[%s1782_s9 + $0x240] sm:$0xff] }
  0xbf   : > { %v599_v34 = vadd.f32 %v471_v30, %v343_v29  ;;  %1106 = vst [vmem:[%s1819_s22 + $0x208] sm:$0xff] %v978_v25  ;;  %v980_v37 = vadd.f32 %v852_v21, %v724_v26  ;;  %v726_v38 = vmul.f32 2.0, %v598_v28  ;;  %v855_v39 = vld [vmem:[%s1790_s17 + $0x230] sm:$0xff]  ;;  %v600_v40 = vadd.f32 %v472_v36, %v344_v35  ;;  %v473_v42 = vld [vmem:[%s1798_s7 + $0x240] sm:$0xff]  ;;  %v856_v45 = vld [vmem:[%s1790_s17 + $0x238] sm:$0xff] }
  0xc0   : > { %1107 = vst [vmem:[%s1819_s22 + $0x210] sm:$0xff] %v979_v31  ;;  %v981_v43 = vadd.f32 %v853_v27, %v725_v32  ;;  %v601_v46 = vadd.f32 %v473_v42, %v345_v41  ;;  %v346_v47 = vld [vmem:[%s1782_s9 + $0x248] sm:$0xff]  ;;  %v857_v51 = vld [vmem:[%s1790_s17 + $0x240] sm:$0xff]  ;;  %v347_v53 = vld [vmem:[%s1782_s9 + $0x250] sm:$0xff] }
  0xc1   : > { %v727_v44 = vmul.f32 2.0, %v599_v34  ;;  %v474_v48 = vld [vmem:[%s1798_s7 + $0x248] sm:$0xff]  ;;  %1108 = vst [vmem:[%s1819_s22 + $0x218] sm:$0xff] %v980_v37  ;;  %v982_v49 = vadd.f32 %v854_v33, %v726_v38  ;;  %v728_v50 = vmul.f32 2.0, %v600_v40  ;;  %v475_v54 = vld [vmem:[%s1798_s7 + $0x250] sm:$0xff]  ;;  %v348_v59 = vld [vmem:[%s1782_s9 + $0x258] sm:$0xff] }
  0xc2   : > { %v602_v52 = vadd.f32 %v474_v48, %v346_v47  ;;  %1109 = vst [vmem:[%s1819_s22 + $0x220] sm:$0xff] %v981_v43  ;;  %v729_v56 = vmul.f32 2.0, %v601_v46  ;;  %v858_v57 = vld [vmem:[%s1790_s17 + $0x248] sm:$0xff]  ;;  %v603_v58 = vadd.f32 %v475_v54, %v347_v53  ;;  %v476_v60 = vld [vmem:[%s1798_s7 + $0x258] sm:$0xff]  ;;  %v859_v63 = vld [vmem:[%s1790_s17 + $0x250] sm:$0xff] }
  0xc3   : > { %v983_v55 = vadd.f32 %v855_v39, %v727_v44  ;;  %1110 = vst [vmem:[%s1819_s22 + $0x228] sm:$0xff] %v982_v49  ;;  %v984_v61 = vadd.f32 %v856_v45, %v728_v50  ;;  %v604_v0 = vadd.f32 %v476_v60, %v348_v59  ;;  %v349_v1 = vld [vmem:[%s1782_s9 + $0x260] sm:$0xff]  ;;  %v860_v5 = vld [vmem:[%s1790_s17 + $0x258] sm:$0xff]  ;;  %v350_v7 = vld [vmem:[%s1782_s9 + $0x268] sm:$0xff] }
  0xc4   : > { %v730_v62 = vmul.f32 2.0, %v602_v52  ;;  %v477_v2 = vld [vmem:[%s1798_s7 + $0x260] sm:$0xff]  ;;  %v985_v3 = vadd.f32 %v857_v51, %v729_v56  ;;  %v731_v4 = vmul.f32 2.0, %v603_v58  ;;  %v478_v8 = vld [vmem:[%s1798_s7 + $0x268] sm:$0xff]  ;;  %v351_v13 = vld [vmem:[%s1782_s9 + $0x270] sm:$0xff] }
  0xc5   : > { %1111 = vst [vmem:[%s1819_s22 + $0x230] sm:$0xff] %v983_v55  ;;  %v605_v6 = vadd.f32 %v477_v2, %v349_v1  ;;  %1112 = vst [vmem:[%s1819_s22 + $0x238] sm:$0xff] %v984_v61  ;;  %v732_v10 = vmul.f32 2.0, %v604_v0  ;;  %v861_v11 = vld [vmem:[%s1790_s17 + $0x260] sm:$0xff]  ;;  %v606_v12 = vadd.f32 %v478_v8, %v350_v7  ;;  %v479_v14 = vld [vmem:[%s1798_s7 + $0x270] sm:$0xff] }
  0xc6   : > { %v986_v9 = vadd.f32 %v858_v57, %v730_v62  ;;  %1113 = vst [vmem:[%s1819_s22 + $0x240] sm:$0xff] %v985_v3  ;;  %v987_v15 = vadd.f32 %v859_v63, %v731_v4  ;;  %v862_v17 = vld [vmem:[%s1790_s17 + $0x268] sm:$0xff]  ;;  %v607_v18 = vadd.f32 %v479_v14, %v351_v13  ;;  %v352_v19 = vld [vmem:[%s1782_s9 + $0x278] sm:$0xff]  ;;  %v863_v23 = vld [vmem:[%s1790_s17 + $0x270] sm:$0xff] }
  0xc7   : > { %v733_v16 = vmul.f32 2.0, %v605_v6  ;;  %v480_v20 = vld [vmem:[%s1798_s7 + $0x278] sm:$0xff]  ;;  %v988_v21 = vadd.f32 %v860_v5, %v732_v10  ;;  %v734_v22 = vmul.f32 2.0, %v606_v12  ;;  %v353_v25 = vld [vmem:[%s1782_s9 + $0x280] sm:$0xff]  ;;  %v354_v31 = vld [vmem:[%s1782_s9 + $0x288] sm:$0xff] }
  0xc8   : > { %1114 = vst [vmem:[%s1819_s22 + $0x248] sm:$0xff] %v986_v9  ;;  %v608_v24 = vadd.f32 %v480_v20, %v352_v19  ;;  %v481_v26 = vld [vmem:[%s1798_s7 + $0x280] sm:$0xff]  ;;  %1115 = vst [vmem:[%s1819_s22 + $0x250] sm:$0xff] %v987_v15  ;;  %v735_v28 = vmul.f32 2.0, %v607_v18  ;;  %v864_v29 = vld [vmem:[%s1790_s17 + $0x278] sm:$0xff] }
  0xc9   : > { %v989_v27 = vadd.f32 %v861_v11, %v733_v16  ;;  %v609_v30 = vadd.f32 %v481_v26, %v353_v25  ;;  %v482_v32 = vld [vmem:[%s1798_s7 + $0x288] sm:$0xff]  ;;  %1116 = vst [vmem:[%s1819_s22 + $0x258] sm:$0xff] %v988_v21  ;;  %v990_v33 = vadd.f32 %v862_v17, %v734_v22  ;;  %v865_v35 = vld [vmem:[%s1790_s17 + $0x280] sm:$0xff]  ;;  %v355_v37 = vld [vmem:[%s1782_s9 + $0x290] sm:$0xff] }
  0xca   : > { %v736_v34 = vmul.f32 2.0, %v608_v24  ;;  %v610_v36 = vadd.f32 %v482_v32, %v354_v31  ;;  %v483_v38 = vld [vmem:[%s1798_s7 + $0x290] sm:$0xff]  ;;  %v991_v39 = vadd.f32 %v863_v23, %v735_v28  ;;  %v866_v41 = vld [vmem:[%s1790_s17 + $0x288] sm:$0xff]  ;;  %v356_v43 = vld [vmem:[%s1782_s9 + $0x298] sm:$0xff] }
  0xcb   : > { %1117 = vst [vmem:[%s1819_s22 + $0x260] sm:$0xff] %v989_v27  ;;  %v737_v40 = vmul.f32 2.0, %v609_v30  ;;  %v611_v42 = vadd.f32 %v483_v38, %v355_v37  ;;  %v484_v44 = vld [vmem:[%s1798_s7 + $0x298] sm:$0xff]  ;;  %1118 = vst [vmem:[%s1819_s22 + $0x268] sm:$0xff] %v990_v33  ;;  %v867_v47 = vld [vmem:[%s1790_s17 + $0x290] sm:$0xff] }
  0xcc   : > { %v992_v45 = vadd.f32 %v864_v29, %v736_v34  ;;  %v738_v46 = vmul.f32 2.0, %v610_v36  ;;  %v612_v48 = vadd.f32 %v484_v44, %v356_v43  ;;  %v357_v49 = vld [vmem:[%s1782_s9 + $0x2a0] sm:$0xff]  ;;  %1119 = vst [vmem:[%s1819_s22 + $0x270] sm:$0xff] %v991_v39  ;;  %v868_v53 = vld [vmem:[%s1790_s17 + $0x298] sm:$0xff]  ;;  %v358_v55 = vld [vmem:[%s1782_s9 + $0x2a8] sm:$0xff] }
  0xcd   : > { %v485_v50 = vld [vmem:[%s1798_s7 + $0x2a0] sm:$0xff]  ;;  %v993_v51 = vadd.f32 %v865_v35, %v737_v40  ;;  %v739_v52 = vmul.f32 2.0, %v611_v42  ;;  %v486_v56 = vld [vmem:[%s1798_s7 + $0x2a8] sm:$0xff]  ;;  %v359_v61 = vld [vmem:[%s1782_s9 + $0x2b0] sm:$0xff] }
  0xce   : > { %v613_v54 = vadd.f32 %v485_v50, %v357_v49  ;;  %1120 = vst [vmem:[%s1819_s22 + $0x278] sm:$0xff] %v992_v45  ;;  %v994_v57 = vadd.f32 %v866_v41, %v738_v46  ;;  %v740_v58 = vmul.f32 2.0, %v612_v48  ;;  %v869_v59 = vld [vmem:[%s1790_s17 + $0x2a0] sm:$0xff]  ;;  %v614_v60 = vadd.f32 %v486_v56, %v358_v55  ;;  %v487_v62 = vld [vmem:[%s1798_s7 + $0x2b0] sm:$0xff]  ;;  %v870_v1 = vld [vmem:[%s1790_s17 + $0x2a8] sm:$0xff] }
  0xcf   : > { %1121 = vst [vmem:[%s1819_s22 + $0x280] sm:$0xff] %v993_v51  ;;  %v995_v63 = vadd.f32 %v867_v47, %v739_v52  ;;  %v615_v2 = vadd.f32 %v487_v62, %v359_v61  ;;  %v360_v3 = vld [vmem:[%s1782_s9 + $0x2b8] sm:$0xff]  ;;  %v871_v7 = vld [vmem:[%s1790_s17 + $0x2b0] sm:$0xff]  ;;  %v361_v9 = vld [vmem:[%s1782_s9 + $0x2c0] sm:$0xff] }
  0xd0   : > { %v741_v0 = vmul.f32 2.0, %v613_v54  ;;  %v488_v4 = vld [vmem:[%s1798_s7 + $0x2b8] sm:$0xff]  ;;  %1122 = vst [vmem:[%s1819_s22 + $0x288] sm:$0xff] %v994_v57  ;;  %v996_v5 = vadd.f32 %v868_v53, %v740_v58  ;;  %v742_v6 = vmul.f32 2.0, %v614_v60  ;;  %v489_v10 = vld [vmem:[%s1798_s7 + $0x2c0] sm:$0xff]  ;;  %v362_v15 = vld [vmem:[%s1782_s9 + $0x2c8] sm:$0xff] }
  0xd1   : > { %v616_v8 = vadd.f32 %v488_v4, %v360_v3  ;;  %1123 = vst [vmem:[%s1819_s22 + $0x290] sm:$0xff] %v995_v63  ;;  %v743_v12 = vmul.f32 2.0, %v615_v2  ;;  %v872_v13 = vld [vmem:[%s1790_s17 + $0x2b8] sm:$0xff]  ;;  %v617_v14 = vadd.f32 %v489_v10, %v361_v9  ;;  %v490_v16 = vld [vmem:[%s1798_s7 + $0x2c8] sm:$0xff]  ;;  %v873_v19 = vld [vmem:[%s1790_s17 + $0x2c0] sm:$0xff] }
  0xd2   : > { %v997_v11 = vadd.f32 %v869_v59, %v741_v0  ;;  %1124 = vst [vmem:[%s1819_s22 + $0x298] sm:$0xff] %v996_v5  ;;  %v998_v17 = vadd.f32 %v870_v1, %v742_v6  ;;  %v618_v20 = vadd.f32 %v490_v16, %v362_v15  ;;  %v363_v21 = vld [vmem:[%s1782_s9 + $0x2d0] sm:$0xff]  ;;  %v874_v25 = vld [vmem:[%s1790_s17 + $0x2c8] sm:$0xff]  ;;  %v364_v27 = vld [vmem:[%s1782_s9 + $0x2d8] sm:$0xff] }
  0xd3   : > { %v744_v18 = vmul.f32 2.0, %v616_v8  ;;  %v491_v22 = vld [vmem:[%s1798_s7 + $0x2d0] sm:$0xff]  ;;  %v999_v23 = vadd.f32 %v871_v7, %v743_v12  ;;  %v745_v24 = vmul.f32 2.0, %v617_v14  ;;  %v492_v28 = vld [vmem:[%s1798_s7 + $0x2d8] sm:$0xff]  ;;  %v365_v33 = vld [vmem:[%s1782_s9 + $0x2e0] sm:$0xff] }
  0xd4   : > { %1125 = vst [vmem:[%s1819_s22 + $0x2a0] sm:$0xff] %v997_v11  ;;  %v619_v26 = vadd.f32 %v491_v22, %v363_v21  ;;  %1126 = vst [vmem:[%s1819_s22 + $0x2a8] sm:$0xff] %v998_v17  ;;  %v746_v30 = vmul.f32 2.0, %v618_v20  ;;  %v875_v31 = vld [vmem:[%s1790_s17 + $0x2d0] sm:$0xff]  ;;  %v620_v32 = vadd.f32 %v492_v28, %v364_v27  ;;  %v493_v34 = vld [vmem:[%s1798_s7 + $0x2e0] sm:$0xff] }
  0xd5   : > { %v1000_v29 = vadd.f32 %v872_v13, %v744_v18  ;;  %1127 = vst [vmem:[%s1819_s22 + $0x2b0] sm:$0xff] %v999_v23  ;;  %v1001_v35 = vadd.f32 %v873_v19, %v745_v24  ;;  %v876_v37 = vld [vmem:[%s1790_s17 + $0x2d8] sm:$0xff]  ;;  %v621_v38 = vadd.f32 %v493_v34, %v365_v33  ;;  %v366_v39 = vld [vmem:[%s1782_s9 + $0x2e8] sm:$0xff]  ;;  %v877_v43 = vld [vmem:[%s1790_s17 + $0x2e0] sm:$0xff] }
  0xd6   : > { %v747_v36 = vmul.f32 2.0, %v619_v26  ;;  %v494_v40 = vld [vmem:[%s1798_s7 + $0x2e8] sm:$0xff]  ;;  %v1002_v41 = vadd.f32 %v874_v25, %v746_v30  ;;  %v748_v42 = vmul.f32 2.0, %v620_v32  ;;  %v367_v45 = vld [vmem:[%s1782_s9 + $0x2f0] sm:$0xff]  ;;  %v368_v51 = vld [vmem:[%s1782_s9 + $0x2f8] sm:$0xff] }
  0xd7   : > { %1128 = vst [vmem:[%s1819_s22 + $0x2b8] sm:$0xff] %v1000_v29  ;;  %v622_v44 = vadd.f32 %v494_v40, %v366_v39  ;;  %v495_v46 = vld [vmem:[%s1798_s7 + $0x2f0] sm:$0xff]  ;;  %1129 = vst [vmem:[%s1819_s22 + $0x2c0] sm:$0xff] %v1001_v35  ;;  %v749_v48 = vmul.f32 2.0, %v621_v38  ;;  %v878_v49 = vld [vmem:[%s1790_s17 + $0x2e8] sm:$0xff] }
  0xd8   : > { %v1003_v47 = vadd.f32 %v875_v31, %v747_v36  ;;  %v623_v50 = vadd.f32 %v495_v46, %v367_v45  ;;  %v496_v52 = vld [vmem:[%s1798_s7 + $0x2f8] sm:$0xff]  ;;  %1130 = vst [vmem:[%s1819_s22 + $0x2c8] sm:$0xff] %v1002_v41  ;;  %v1004_v53 = vadd.f32 %v876_v37, %v748_v42  ;;  %v879_v55 = vld [vmem:[%s1790_s17 + $0x2f0] sm:$0xff]  ;;  %v369_v57 = vld [vmem:[%s1782_s9 + $0x300] sm:$0xff] }
  0xd9   : > { %v750_v54 = vmul.f32 2.0, %v622_v44  ;;  %v624_v56 = vadd.f32 %v496_v52, %v368_v51  ;;  %v497_v58 = vld [vmem:[%s1798_s7 + $0x300] sm:$0xff]  ;;  %v1005_v59 = vadd.f32 %v877_v43, %v749_v48  ;;  %v880_v61 = vld [vmem:[%s1790_s17 + $0x2f8] sm:$0xff]  ;;  %v370_v63 = vld [vmem:[%s1782_s9 + $0x308] sm:$0xff] }
  0xda   : > { %1131 = vst [vmem:[%s1819_s22 + $0x2d0] sm:$0xff] %v1003_v47  ;;  %v751_v60 = vmul.f32 2.0, %v623_v50  ;;  %v625_v62 = vadd.f32 %v497_v58, %v369_v57  ;;  %v498_v0 = vld [vmem:[%s1798_s7 + $0x308] sm:$0xff]  ;;  %1132 = vst [vmem:[%s1819_s22 + $0x2d8] sm:$0xff] %v1004_v53  ;;  %v881_v3 = vld [vmem:[%s1790_s17 + $0x300] sm:$0xff] }
  0xdb   : > { %v1006_v1 = vadd.f32 %v878_v49, %v750_v54  ;;  %v752_v2 = vmul.f32 2.0, %v624_v56  ;;  %v626_v4 = vadd.f32 %v498_v0, %v370_v63  ;;  %v371_v5 = vld [vmem:[%s1782_s9 + $0x310] sm:$0xff]  ;;  %1133 = vst [vmem:[%s1819_s22 + $0x2e0] sm:$0xff] %v1005_v59  ;;  %v882_v9 = vld [vmem:[%s1790_s17 + $0x308] sm:$0xff]  ;;  %v372_v11 = vld [vmem:[%s1782_s9 + $0x318] sm:$0xff] }
  0xdc   : > { %v499_v6 = vld [vmem:[%s1798_s7 + $0x310] sm:$0xff]  ;;  %v1007_v7 = vadd.f32 %v879_v55, %v751_v60  ;;  %v753_v8 = vmul.f32 2.0, %v625_v62  ;;  %v500_v12 = vld [vmem:[%s1798_s7 + $0x318] sm:$0xff]  ;;  %v373_v17 = vld [vmem:[%s1782_s9 + $0x320] sm:$0xff] }
  0xdd   : > { %v627_v10 = vadd.f32 %v499_v6, %v371_v5  ;;  %1134 = vst [vmem:[%s1819_s22 + $0x2e8] sm:$0xff] %v1006_v1  ;;  %v1008_v13 = vadd.f32 %v880_v61, %v752_v2  ;;  %v754_v14 = vmul.f32 2.0, %v626_v4  ;;  %v883_v15 = vld [vmem:[%s1790_s17 + $0x310] sm:$0xff]  ;;  %v628_v16 = vadd.f32 %v500_v12, %v372_v11  ;;  %v501_v18 = vld [vmem:[%s1798_s7 + $0x320] sm:$0xff]  ;;  %v884_v21 = vld [vmem:[%s1790_s17 + $0x318] sm:$0xff] }
  0xde   : > { %1135 = vst [vmem:[%s1819_s22 + $0x2f0] sm:$0xff] %v1007_v7  ;;  %v1009_v19 = vadd.f32 %v881_v3, %v753_v8  ;;  %v629_v22 = vadd.f32 %v501_v18, %v373_v17  ;;  %v374_v23 = vld [vmem:[%s1782_s9 + $0x328] sm:$0xff]  ;;  %v885_v27 = vld [vmem:[%s1790_s17 + $0x320] sm:$0xff]  ;;  %v375_v29 = vld [vmem:[%s1782_s9 + $0x330] sm:$0xff] }
  0xdf   : > { %v755_v20 = vmul.f32 2.0, %v627_v10  ;;  %v502_v24 = vld [vmem:[%s1798_s7 + $0x328] sm:$0xff]  ;;  %1136 = vst [vmem:[%s1819_s22 + $0x2f8] sm:$0xff] %v1008_v13  ;;  %v1010_v25 = vadd.f32 %v882_v9, %v754_v14  ;;  %v756_v26 = vmul.f32 2.0, %v628_v16  ;;  %v503_v30 = vld [vmem:[%s1798_s7 + $0x330] sm:$0xff]  ;;  %v376_v35 = vld [vmem:[%s1782_s9 + $0x338] sm:$0xff] }
  0xe0   : > { %v630_v28 = vadd.f32 %v502_v24, %v374_v23  ;;  %1137 = vst [vmem:[%s1819_s22 + $0x300] sm:$0xff] %v1009_v19  ;;  %v757_v32 = vmul.f32 2.0, %v629_v22  ;;  %v886_v33 = vld [vmem:[%s1790_s17 + $0x328] sm:$0xff]  ;;  %v631_v34 = vadd.f32 %v503_v30, %v375_v29  ;;  %v504_v36 = vld [vmem:[%s1798_s7 + $0x338] sm:$0xff]  ;;  %v887_v39 = vld [vmem:[%s1790_s17 + $0x330] sm:$0xff] }
  0xe1   : > { %v1011_v31 = vadd.f32 %v883_v15, %v755_v20  ;;  %1138 = vst [vmem:[%s1819_s22 + $0x308] sm:$0xff] %v1010_v25  ;;  %v1012_v37 = vadd.f32 %v884_v21, %v756_v26  ;;  %v632_v40 = vadd.f32 %v504_v36, %v376_v35  ;;  %v377_v41 = vld [vmem:[%s1782_s9 + $0x340] sm:$0xff]  ;;  %v888_v45 = vld [vmem:[%s1790_s17 + $0x338] sm:$0xff]  ;;  %v378_v47 = vld [vmem:[%s1782_s9 + $0x348] sm:$0xff] }
  0xe2   : > { %v758_v38 = vmul.f32 2.0, %v630_v28  ;;  %v505_v42 = vld [vmem:[%s1798_s7 + $0x340] sm:$0xff]  ;;  %v1013_v43 = vadd.f32 %v885_v27, %v757_v32  ;;  %v759_v44 = vmul.f32 2.0, %v631_v34  ;;  %v506_v48 = vld [vmem:[%s1798_s7 + $0x348] sm:$0xff]  ;;  %v379_v53 = vld [vmem:[%s1782_s9 + $0x350] sm:$0xff] }
  0xe3   : > { %1139 = vst [vmem:[%s1819_s22 + $0x310] sm:$0xff] %v1011_v31  ;;  %v633_v46 = vadd.f32 %v505_v42, %v377_v41  ;;  %1140 = vst [vmem:[%s1819_s22 + $0x318] sm:$0xff] %v1012_v37  ;;  %v760_v50 = vmul.f32 2.0, %v632_v40  ;;  %v889_v51 = vld [vmem:[%s1790_s17 + $0x340] sm:$0xff]  ;;  %v634_v52 = vadd.f32 %v506_v48, %v378_v47  ;;  %v507_v54 = vld [vmem:[%s1798_s7 + $0x350] sm:$0xff] }
  0xe4   : > { %v1014_v49 = vadd.f32 %v886_v33, %v758_v38  ;;  %1141 = vst [vmem:[%s1819_s22 + $0x320] sm:$0xff] %v1013_v43  ;;  %v1015_v55 = vadd.f32 %v887_v39, %v759_v44  ;;  %v890_v57 = vld [vmem:[%s1790_s17 + $0x348] sm:$0xff]  ;;  %v635_v58 = vadd.f32 %v507_v54, %v379_v53  ;;  %v380_v59 = vld [vmem:[%s1782_s9 + $0x358] sm:$0xff]  ;;  %v891_v63 = vld [vmem:[%s1790_s17 + $0x350] sm:$0xff] }
  0xe5   : > { %v761_v56 = vmul.f32 2.0, %v633_v46  ;;  %v508_v60 = vld [vmem:[%s1798_s7 + $0x358] sm:$0xff]  ;;  %v1016_v61 = vadd.f32 %v888_v45, %v760_v50  ;;  %v762_v62 = vmul.f32 2.0, %v634_v52  ;;  %v381_v1 = vld [vmem:[%s1782_s9 + $0x360] sm:$0xff]  ;;  %v382_v7 = vld [vmem:[%s1782_s9 + $0x368] sm:$0xff] }
  0xe6   : > { %1142 = vst [vmem:[%s1819_s22 + $0x328] sm:$0xff] %v1014_v49  ;;  %v636_v0 = vadd.f32 %v508_v60, %v380_v59  ;;  %v509_v2 = vld [vmem:[%s1798_s7 + $0x360] sm:$0xff]  ;;  %1143 = vst [vmem:[%s1819_s22 + $0x330] sm:$0xff] %v1015_v55  ;;  %v763_v4 = vmul.f32 2.0, %v635_v58  ;;  %v892_v5 = vld [vmem:[%s1790_s17 + $0x358] sm:$0xff] }
  0xe7   : > { %v1017_v3 = vadd.f32 %v889_v51, %v761_v56  ;;  %v637_v6 = vadd.f32 %v509_v2, %v381_v1  ;;  %v510_v8 = vld [vmem:[%s1798_s7 + $0x368] sm:$0xff]  ;;  %1144 = vst [vmem:[%s1819_s22 + $0x338] sm:$0xff] %v1016_v61  ;;  %v1018_v9 = vadd.f32 %v890_v57, %v762_v62  ;;  %v893_v11 = vld [vmem:[%s1790_s17 + $0x360] sm:$0xff]  ;;  %v383_v13 = vld [vmem:[%s1782_s9 + $0x370] sm:$0xff] }
  0xe8   : > { %v764_v10 = vmul.f32 2.0, %v636_v0  ;;  %v638_v12 = vadd.f32 %v510_v8, %v382_v7  ;;  %v511_v14 = vld [vmem:[%s1798_s7 + $0x370] sm:$0xff]  ;;  %v1019_v15 = vadd.f32 %v891_v63, %v763_v4  ;;  %v894_v17 = vld [vmem:[%s1790_s17 + $0x368] sm:$0xff]  ;;  %v384_v19 = vld [vmem:[%s1782_s9 + $0x378] sm:$0xff] }
  0xe9   : > { %1145 = vst [vmem:[%s1819_s22 + $0x340] sm:$0xff] %v1017_v3  ;;  %v765_v16 = vmul.f32 2.0, %v637_v6  ;;  %v639_v18 = vadd.f32 %v511_v14, %v383_v13  ;;  %v512_v20 = vld [vmem:[%s1798_s7 + $0x378] sm:$0xff]  ;;  %1146 = vst [vmem:[%s1819_s22 + $0x348] sm:$0xff] %v1018_v9  ;;  %v895_v23 = vld [vmem:[%s1790_s17 + $0x370] sm:$0xff] }
  0xea   : > { %v1020_v21 = vadd.f32 %v892_v5, %v764_v10  ;;  %v766_v22 = vmul.f32 2.0, %v638_v12  ;;  %v640_v24 = vadd.f32 %v512_v20, %v384_v19  ;;  %v385_v25 = vld [vmem:[%s1782_s9 + $0x380] sm:$0xff]  ;;  %1147 = vst [vmem:[%s1819_s22 + $0x350] sm:$0xff] %v1019_v15  ;;  %v896_v29 = vld [vmem:[%s1790_s17 + $0x378] sm:$0xff]  ;;  %v386_v31 = vld [vmem:[%s1782_s9 + $0x388] sm:$0xff] }
  0xeb   : > { %v513_v26 = vld [vmem:[%s1798_s7 + $0x380] sm:$0xff]  ;;  %v1021_v27 = vadd.f32 %v893_v11, %v765_v16  ;;  %v767_v28 = vmul.f32 2.0, %v639_v18  ;;  %v514_v32 = vld [vmem:[%s1798_s7 + $0x388] sm:$0xff]  ;;  %v387_v37 = vld [vmem:[%s1782_s9 + $0x390] sm:$0xff] }
  0xec   : > { %v641_v30 = vadd.f32 %v513_v26, %v385_v25  ;;  %1148 = vst [vmem:[%s1819_s22 + $0x358] sm:$0xff] %v1020_v21  ;;  %v1022_v33 = vadd.f32 %v894_v17, %v766_v22  ;;  %v768_v34 = vmul.f32 2.0, %v640_v24  ;;  %v897_v35 = vld [vmem:[%s1790_s17 + $0x380] sm:$0xff]  ;;  %v642_v36 = vadd.f32 %v514_v32, %v386_v31  ;;  %v515_v38 = vld [vmem:[%s1798_s7 + $0x390] sm:$0xff]  ;;  %v898_v41 = vld [vmem:[%s1790_s17 + $0x388] sm:$0xff] }
  0xed   : > { %1149 = vst [vmem:[%s1819_s22 + $0x360] sm:$0xff] %v1021_v27  ;;  %v1023_v39 = vadd.f32 %v895_v23, %v767_v28  ;;  %v643_v42 = vadd.f32 %v515_v38, %v387_v37  ;;  %v388_v43 = vld [vmem:[%s1782_s9 + $0x398] sm:$0xff]  ;;  %v899_v47 = vld [vmem:[%s1790_s17 + $0x390] sm:$0xff]  ;;  %v389_v49 = vld [vmem:[%s1782_s9 + $0x3a0] sm:$0xff] }
  0xee   : > { %v769_v40 = vmul.f32 2.0, %v641_v30  ;;  %v516_v44 = vld [vmem:[%s1798_s7 + $0x398] sm:$0xff]  ;;  %1150 = vst [vmem:[%s1819_s22 + $0x368] sm:$0xff] %v1022_v33  ;;  %v1024_v45 = vadd.f32 %v896_v29, %v768_v34  ;;  %v770_v46 = vmul.f32 2.0, %v642_v36  ;;  %v517_v50 = vld [vmem:[%s1798_s7 + $0x3a0] sm:$0xff]  ;;  %v390_v55 = vld [vmem:[%s1782_s9 + $0x3a8] sm:$0xff] }
  0xef   : > { %v644_v48 = vadd.f32 %v516_v44, %v388_v43  ;;  %1151 = vst [vmem:[%s1819_s22 + $0x370] sm:$0xff] %v1023_v39  ;;  %v771_v52 = vmul.f32 2.0, %v643_v42  ;;  %v900_v53 = vld [vmem:[%s1790_s17 + $0x398] sm:$0xff]  ;;  %v645_v54 = vadd.f32 %v517_v50, %v389_v49  ;;  %v518_v56 = vld [vmem:[%s1798_s7 + $0x3a8] sm:$0xff]  ;;  %v901_v59 = vld [vmem:[%s1790_s17 + $0x3a0] sm:$0xff] }
  0xf0   : > { %v1025_v51 = vadd.f32 %v897_v35, %v769_v40  ;;  %1152 = vst [vmem:[%s1819_s22 + $0x378] sm:$0xff] %v1024_v45  ;;  %v1026_v57 = vadd.f32 %v898_v41, %v770_v46  ;;  %v646_v60 = vadd.f32 %v518_v56, %v390_v55  ;;  %v391_v61 = vld [vmem:[%s1782_s9 + $0x3b0] sm:$0xff]  ;;  %v902_v1 = vld [vmem:[%s1790_s17 + $0x3a8] sm:$0xff]  ;;  %v392_v3 = vld [vmem:[%s1782_s9 + $0x3b8] sm:$0xff] }
  0xf1   : > { %v772_v58 = vmul.f32 2.0, %v644_v48  ;;  %v519_v62 = vld [vmem:[%s1798_s7 + $0x3b0] sm:$0xff]  ;;  %v1027_v63 = vadd.f32 %v899_v47, %v771_v52  ;;  %v773_v0 = vmul.f32 2.0, %v645_v54  ;;  %v520_v4 = vld [vmem:[%s1798_s7 + $0x3b8] sm:$0xff]  ;;  %v393_v9 = vld [vmem:[%s1782_s9 + $0x3c0] sm:$0xff] }
  0xf2   : > { %1153 = vst [vmem:[%s1819_s22 + $0x380] sm:$0xff] %v1025_v51  ;;  %v647_v2 = vadd.f32 %v519_v62, %v391_v61  ;;  %1154 = vst [vmem:[%s1819_s22 + $0x388] sm:$0xff] %v1026_v57  ;;  %v774_v6 = vmul.f32 2.0, %v646_v60  ;;  %v903_v7 = vld [vmem:[%s1790_s17 + $0x3b0] sm:$0xff]  ;;  %v648_v8 = vadd.f32 %v520_v4, %v392_v3  ;;  %v521_v10 = vld [vmem:[%s1798_s7 + $0x3c0] sm:$0xff] }
  0xf3   : > { %v1028_v5 = vadd.f32 %v900_v53, %v772_v58  ;;  %1155 = vst [vmem:[%s1819_s22 + $0x390] sm:$0xff] %v1027_v63  ;;  %v1029_v11 = vadd.f32 %v901_v59, %v773_v0  ;;  %v904_v13 = vld [vmem:[%s1790_s17 + $0x3b8] sm:$0xff]  ;;  %v649_v14 = vadd.f32 %v521_v10, %v393_v9  ;;  %v394_v15 = vld [vmem:[%s1782_s9 + $0x3c8] sm:$0xff]  ;;  %v905_v19 = vld [vmem:[%s1790_s17 + $0x3c0] sm:$0xff] }
  0xf4   : > { %v775_v12 = vmul.f32 2.0, %v647_v2  ;;  %v522_v16 = vld [vmem:[%s1798_s7 + $0x3c8] sm:$0xff]  ;;  %v1030_v17 = vadd.f32 %v902_v1, %v774_v6  ;;  %v776_v18 = vmul.f32 2.0, %v648_v8  ;;  %v395_v21 = vld [vmem:[%s1782_s9 + $0x3d0] sm:$0xff]  ;;  %v396_v27 = vld [vmem:[%s1782_s9 + $0x3d8] sm:$0xff] }
  0xf5   : > { %1156 = vst [vmem:[%s1819_s22 + $0x398] sm:$0xff] %v1028_v5  ;;  %v650_v20 = vadd.f32 %v522_v16, %v394_v15  ;;  %v523_v22 = vld [vmem:[%s1798_s7 + $0x3d0] sm:$0xff]  ;;  %1157 = vst [vmem:[%s1819_s22 + $0x3a0] sm:$0xff] %v1029_v11  ;;  %v777_v24 = vmul.f32 2.0, %v649_v14  ;;  %v906_v25 = vld [vmem:[%s1790_s17 + $0x3c8] sm:$0xff] }
  0xf6   : > { %v1031_v23 = vadd.f32 %v903_v7, %v775_v12  ;;  %v651_v26 = vadd.f32 %v523_v22, %v395_v21  ;;  %v524_v28 = vld [vmem:[%s1798_s7 + $0x3d8] sm:$0xff]  ;;  %1158 = vst [vmem:[%s1819_s22 + $0x3a8] sm:$0xff] %v1030_v17  ;;  %v1032_v29 = vadd.f32 %v904_v13, %v776_v18  ;;  %v907_v31 = vld [vmem:[%s1790_s17 + $0x3d0] sm:$0xff]  ;;  %v397_v33 = vld [vmem:[%s1782_s9 + $0x3e0] sm:$0xff] }
  0xf7   : > { %v778_v30 = vmul.f32 2.0, %v650_v20  ;;  %v652_v32 = vadd.f32 %v524_v28, %v396_v27  ;;  %v525_v34 = vld [vmem:[%s1798_s7 + $0x3e0] sm:$0xff]  ;;  %v1033_v35 = vadd.f32 %v905_v19, %v777_v24  ;;  %v908_v37 = vld [vmem:[%s1790_s17 + $0x3d8] sm:$0xff]  ;;  %v398_v39 = vld [vmem:[%s1782_s9 + $0x3e8] sm:$0xff] }
  0xf8   : > { %1159 = vst [vmem:[%s1819_s22 + $0x3b0] sm:$0xff] %v1031_v23  ;;  %v779_v36 = vmul.f32 2.0, %v651_v26  ;;  %v653_v38 = vadd.f32 %v525_v34, %v397_v33  ;;  %v526_v40 = vld [vmem:[%s1798_s7 + $0x3e8] sm:$0xff]  ;;  %1160 = vst [vmem:[%s1819_s22 + $0x3b8] sm:$0xff] %v1032_v29  ;;  %v909_v43 = vld [vmem:[%s1790_s17 + $0x3e0] sm:$0xff] }
  0xf9   : > { %v1034_v41 = vadd.f32 %v906_v25, %v778_v30  ;;  %v780_v42 = vmul.f32 2.0, %v652_v32  ;;  %v654_v44 = vadd.f32 %v526_v40, %v398_v39  ;;  %v399_v45 = vld [vmem:[%s1782_s9 + $0x3f0] sm:$0xff]  ;;  %1161 = vst [vmem:[%s1819_s22 + $0x3c0] sm:$0xff] %v1033_v35  ;;  %v910_v49 = vld [vmem:[%s1790_s17 + $0x3e8] sm:$0xff]  ;;  %v400_v51 = vld [vmem:[%s1782_s9 + $0x3f8] sm:$0xff] }
  0xfa   : > { %v527_v46 = vld [vmem:[%s1798_s7 + $0x3f0] sm:$0xff]  ;;  %v1035_v47 = vadd.f32 %v907_v31, %v779_v36  ;;  %v781_v48 = vmul.f32 2.0, %v653_v38  ;;  %v528_v52 = vld [vmem:[%s1798_s7 + $0x3f8] sm:$0xff] }
  0xfb   : > { %v655_v50 = vadd.f32 %v527_v46, %v399_v45  ;;  %1162 = vst [vmem:[%s1819_s22 + $0x3c8] sm:$0xff] %v1034_v41  ;;  %v1036_v53 = vadd.f32 %v908_v37, %v780_v42  ;;  %v782_v54 = vmul.f32 2.0, %v654_v44  ;;  %v911_v55 = vld [vmem:[%s1790_s17 + $0x3f0] sm:$0xff]  ;;  %v656_v56 = vadd.f32 %v528_v52, %v400_v51  ;;  %v912_v59 = vld [vmem:[%s1790_s17 + $0x3f8] sm:$0xff] }
  0xfc   : > { %1163 = vst [vmem:[%s1819_s22 + $0x3d0] sm:$0xff] %v1035_v47  ;;  %v1037_v57 = vadd.f32 %v909_v43, %v781_v48 }
  0xfd   : > { %v783_v58 = vmul.f32 2.0, %v655_v50  ;;  %1164 = vst [vmem:[%s1819_s22 + $0x3d8] sm:$0xff] %v1036_v53  ;;  %v1038_v60 = vadd.f32 %v910_v49, %v782_v54  ;;  %v784_v61 = vmul.f32 2.0, %v656_v56 }
  0xfe   : > { %1165 = vst [vmem:[%s1819_s22 + $0x3e0] sm:$0xff] %v1037_v57 }
  0xff   : > { %v1039_v62 = vadd.f32 %v911_v55, %v783_v58  ;;  %1166 = vst [vmem:[%s1819_s22 + $0x3e8] sm:$0xff] %v1038_v60  ;;  %v1040_v63 = vadd.f32 %v912_v59, %v784_v61 }
 0x101   : > { %1167 = vst [vmem:[%s1819_s22 + $0x3f0] sm:$0xff] %v1039_v62  ;;  %1168 = vst [vmem:[%s1819_s22 + $0x3f8] sm:$0xff] %v1040_v63 }
 0x102   : > { %1497 = shalt.err (!%p1494_p9)
}
 0x103   : > { %s1498_s20 = scalar_lea.hbm %s2316_s5, 16384  ;;  %s1502_s9 = scalar_lea.hbm %s2367_s3, 131072 }
 0x104   : > { %p1499_p11 = scmp.ne.s32.totalorder %s2316_s5, %s1498_s20  ;;  %p1503_p4 = scmp.lt.u32.totalorder %s2316_s5, %s2367_s3 }
 0x105   : > { %p1504_p1 = scmp.lt.u32.totalorder %s1502_s9, %s1498_s20  ;;  %p1506_p12 = scmp.lt.u32.totalorder %s1498_s20, %s2316_s5 }
 0x106   : > { %p1500_p7 = pnand %p1499_p11, %p2387_p5 }
 0x107   : > { %p1505_p0 = por %p1504_p1, %p1503_p4 }
 0x108   : > { %p1501_p2 = pneg %p1500_p7 }
 0x109   : > { %p1507_p6 = por %p1506_p12, %p1505_p0 }
 0x10b   : > { %p1508_p10 = pnand %p1507_p6, %p1501_p2 }
 0x10d   : > { %1511 = shalt.err (!%p1508_p10)
}
 0x10e   : > { %s1562_s17 = smov 1024   ;;  %s1563_s7 = smov 64  }
 0x10f   : > { %1340 = dma.vmem_to_hbm [thread:$0]  (%p2387_p5), %s2318_s11, 16384, %s2316_s5, %s1170_s16, %s1562_s17, %s1562_s17, %s1563_s7  }
 0x110 PF: > { %p1357_p13 = scmp.ge.s32.totalorder %s1554_s15, 2  ;;  %s1199_s22 = sand.u32 1, %s1542_s12  }
 0x111   : > { %p2388_p3 = scmp.ne.s32.totalorder %s2377_s24, 0  ;;  %s1200_s4 = scalar_lea.sflag [#allocation4], %s1199_s22 }
 0x113   : > { %p1353_p8 = pnand %p1357_p13, %p2388_p3 }
 0x115   : > { %1537 = dma.done.wait (!%p1353_p8), %s1200_s4, 16384  }
 0x116   : > { %1539 = vsyncadd (!%p1353_p8), %s1200_s4, 4294950912  ;;  %p19_p9 = scmp.ge.s32.totalorder %s1609_s18, 10   ;;  %s2389_s12 = smov %s1546_s13 }
 0x117   : > { %s2390_s13 = smov %s1550_s14  ;;  %s2391_s14 = smov %s1621_s21 }
 0x118   : > { %s2392_s15 = smov %s1609_s18  ;;  %21 = sbr.rel (!%p19_p9) target bundleno = 9 (0x9), region = 101 }
 0x11f   :  { %1205 = vsyncpa [#allocation3], 1 }
 0x120   :  { %1207 = vsyncpa [#allocation3 + $0x1], 1 }
 0x121   :  { %1208 = vsyncpa [#allocation6], 1 }
 0x122   :  { %1210 = vsyncpa [#allocation6 + $0x1], 1 }
 0x123   :  { %1211 = vsyncpa [#allocation4], 1 }
 0x124   :  { %1213 = vsyncpa [#allocation4 + $0x1], 1 }

</bundles_post_ra>
